<compile_context>
chip_gen: v5e
topology: v5e:2x2
jax: 0.10.0
libtpu: 0.0.40
codegen_flags: <defaults>
</compile_context>

<pallas_src>
import jax
import jax.numpy as jnp
from jax.experimental import pallas as pl
from jax.experimental.pallas import tpu as pltpu

C_CONV = 16        # conv1 out_channels
HID = 32           # LSTM hidden size
GATES = 4 * HID    # 128 -> exactly one lane-width
FC1 = 64
NUM_CLASSES = 4
NC_PAD = 128       # lane-dense padded logits width


# ------------------------- fused kernel -------------------------

def cnn_lstm_kernel(a0_ref, a1_ref, a2_ref, a3_ref, cw_ref, cb_ref, wih_ref,
                    bl_ref, whh_ref, w1_ref, b1_ref, w2_ref, b2_ref,
                    out_ref, h_ref, c_ref):
    # a0..a3 : (Bb, Tc) taps x_pad[2t], x_pad[2t+1], x_pad[2t+2], x_pad[2t+3]
    # cw     : (3, C) f32 conv weights (tap-major);  cb : (1, C) f32
    # wih    : (C, 4H) bf16 (g-band *2);  bl : (1, 4H) f32 = b_ih+b_hh (g-band *2)
    # whh    : (H, 4H) bf16 (g-band *2)
    # w1     : (H, FC1) bf16;  b1 : (1, FC1) f32
    # w2     : (FC1, 128) bf16 (padded);  b2 : (1, 128) f32 (padded)
    # out    : (Bb, 128) f32;  h_ref/c_ref : (Bb, H) f32 VMEM scratch (chunk carry)
    j = pl.program_id(1)
    nj = pl.num_programs(1)
    Bb, Tc = a0_ref.shape
    C = cw_ref.shape[1]
    H = h_ref.shape[1]
    G = whh_ref.shape[1]          # 4H

    @pl.when(j == 0)
    def _init():                  # fresh LSTM state at the start of each batch tile
        h_ref[...] = jnp.zeros_like(h_ref)
        c_ref[...] = jnp.zeros_like(c_ref)

    # ---- Conv1d(k=3, pad=1) + ReLU + MaxPool1d(2) on this time chunk, on-chip ----
    taps = (a0_ref[...], a1_ref[...], a2_ref[...], a3_ref[...])
    cw = cw_ref[...]
    cb = cb_ref[...]

    def conv_phase(p):            # conv output at positions 2t+p for all t in chunk
        acc = taps[p][:, :, None] * cw[0:1, :][None, :, :]
        acc = acc + taps[p + 1][:, :, None] * cw[1:2, :][None, :, :]
        acc = acc + taps[p + 2][:, :, None] * cw[2:3, :][None, :, :]
        return acc + cb[None, :, :]                         # (Bb, Tc, C)

    pooled = jnp.maximum(jnp.maximum(conv_phase(0), 0.0),
                         jnp.maximum(conv_phase(1), 0.0))    # (Bb, Tc, C) f32

    # ---- LSTM input projection: ONE MXU contraction for the whole chunk ----
    proj = jnp.dot(pooled.reshape(Bb * Tc, C).astype(jnp.bfloat16), wih_ref[...],
                   preferred_element_type=jnp.float32)       # (Bb*Tc, 4H) f32
    xg = (proj + bl_ref[...]).reshape(Bb, Tc, G)             # x_t @ W_ih^T + b, all t

    # ---- LSTM recurrence (PyTorch gate order [i, f, g, o]) ----
    whh = whh_ref[...]                                       # bf16, g-band pre-scaled by 2
    lane = jax.lax.broadcasted_iota(jnp.int32, (Bb, G), 1)
    is_g = jnp.logical_and(lane >= 2 * H, lane < 3 * H)      # tanh band mask (hoisted)

    h = h_ref[...]
    c = c_ref[...]
    for t in range(Tc):           # static unroll; Tc is bounded by the time-chunk grid axis
        gates = xg[:, t, :] + jnp.dot(h.astype(jnp.bfloat16), whh,
                                      preferred_element_type=jnp.float32)   # (Bb, 4H)
        gates = jnp.maximum(gates, -60.0)                    # keep exp(-gates) finite
        # single full-vreg exp + EUP approx reciprocal per step; tanh via 2*sig-1
        sig = pl.reciprocal(1.0 + jnp.exp(-gates), approx=True)
        act = jnp.where(is_g, 2.0 * sig - 1.0, sig)
        i_g = act[:, 0:H]
        f_g = act[:, H:2 * H]
        g_g = act[:, 2 * H:3 * H]
        o_g = act[:, 3 * H:4 * H]
        c = f_g * c + i_g * g_g
        h = o_g * jnp.tanh(c)
    h_ref[...] = h
    c_ref[...] = c

    # ---- MLP head, only at the final time chunk ----
    @pl.when(j == nj - 1)
    def _head():
        z = jnp.dot(h.astype(jnp.bfloat16), w1_ref[...],
                    preferred_element_type=jnp.float32) + b1_ref[...]
        z = jnp.maximum(z, 0.0)
        # TODO(synk): nn.Dropout(0.3) implemented as identity (inference semantics).
        out_ref[...] = jnp.dot(z.astype(jnp.bfloat16), w2_ref[...],
                               preferred_element_type=jnp.float32) + b2_ref[...]


# ------------------------- params -------------------------

def init_params(key):
    ks = jax.random.split(key, 10)

    def u(k, shape, fan_in):
        s = 1.0 / (fan_in ** 0.5)
        return jax.random.uniform(k, shape, jnp.float32, -s, s)

    return {
        "conv_w": u(ks[0], (C_CONV, 1, 3), 3),          # PyTorch layout (out_c, in_c, k)
        "conv_b": u(ks[1], (C_CONV,), 3),
        "w_ih": u(ks[2], (4 * HID, C_CONV), HID),       # PyTorch LSTM layout (4H, C)
        "w_hh": u(ks[3], (4 * HID, HID), HID),
        "b_ih": u(ks[4], (4 * HID,), HID),
        "b_hh": u(ks[5], (4 * HID,), HID),
        "fc1_w": u(ks[6], (FC1, HID), HID),             # (out, in)
        "fc1_b": u(ks[7], (FC1,), HID),
        "fc2_w": u(ks[8], (NUM_CLASSES, FC1), FC1),
        "fc2_b": u(ks[9], (NUM_CLASSES,), FC1),
    }


def pack_params(p):
    """One-time layout prep: transpose / combine / pad / cast weights into kernel layouts.

    tanh(x) = 2*sigmoid(2x) - 1, so the g-gate band (columns [2H, 3H)) of the LSTM
    weights and combined bias is pre-scaled by 2; the kernel then only computes a
    sigmoid per step and maps the g band with 2*sig-1.
    """
    pad = NC_PAD - NUM_CLASSES
    g_scale = jnp.ones((GATES,), jnp.float32).at[2 * HID:3 * HID].set(2.0)
    wih = jnp.transpose(p["w_ih"], (1, 0)) * g_scale[None, :]
    whh = jnp.transpose(p["w_hh"], (1, 0)) * g_scale[None, :]
    bl = (p["b_ih"] + p["b_hh"]) * g_scale
    return {
        "cw": jnp.transpose(p["conv_w"][:, 0, :], (1, 0)),                   # (3, C) f32
        "cb": p["conv_b"][None, :],                                           # (1, C) f32
        "wih": wih.astype(jnp.bfloat16),                                      # (C, 4H)
        "bl": bl[None, :],                                                    # (1, 4H) f32
        "whh": whh.astype(jnp.bfloat16),                                      # (H, 4H)
        "w1": jnp.transpose(p["fc1_w"], (1, 0)).astype(jnp.bfloat16),         # (H, FC1)
        "b1": p["fc1_b"][None, :],                                            # (1, FC1) f32
        "w2": jnp.pad(jnp.transpose(p["fc2_w"], (1, 0)),
                      ((0, 0), (0, pad))).astype(jnp.bfloat16),               # (FC1, 128)
        "b2": jnp.pad(p["fc2_b"][None, :], ((0, 0), (0, pad))),               # (1, 128) f32
    }


# ------------------------- blocking heuristics -------------------------

def _pick_batch_block(B):
    # Prefer >= 2 batch tiles (v7x dual TensorCore) while keeping blocks <= 64
    # (vreg pressure in the serial recurrence step) and 8-sublane aligned.
    best = None
    for cand in (64, 32, 16, 8):
        if B % cand == 0:
            if best is None:
                best = cand
            if B // cand >= 2:
                return cand
    return best if best is not None else B       # tiny / ragged batch: full-batch block


def _pick_time_chunk(T):
    # Time chunk = per-grid-step recurrence length (static unroll inside the kernel).
    # Bounded so the per-chunk xg slab (b_blk*Tc*128 f32) stays far below VMEM.
    if T <= 128:
        return T
    for cand in (128, 96, 64, 32, 16, 8):
        if T % cand == 0:
            return cand
    for d in range(128, 1, -1):                  # awkward T: any divisor (correct, slower)
        if T % d == 0:
            return d
    return T


# ------------------------- forward -------------------------

def cnn_lstm_forward(x, packed):
    # x: (B, 1, L) float32 (PyTorch NCL layout)
    B, c_in, L = x.shape
    assert c_in == 1 and L % 2 == 0
    T = L // 2

    # Cheap XLA glue: zero-pad for conv padding=1 and pre-slice the four taps
    # x_pad[2t..2t+3] needed by conv+maxpool, then fold the time-chunk axis to the
    # front so chunk blocks keep Tc as the (full-extent) lane dimension.
    xp = jnp.pad(x[:, 0, :], ((0, 0), (1, 1)))          # (B, 2T+2)
    xe = xp[:, 0::2]                                    # (B, T+1)
    xo = xp[:, 1::2]
    taps = (xe[:, :T], xo[:, :T], xe[:, 1:], xo[:, 1:])  # each (B, T)

    b_blk = _pick_batch_block(B)
    Tc = _pick_time_chunk(T)
    n_chunks = T // Tc
    grid = (B // b_blk, n_chunks)

    def chunked(a):                                     # (B, T) -> (n_chunks, B, Tc)
        return jnp.transpose(a.reshape(B, n_chunks, Tc), (1, 0, 2))

    taps_c = tuple(chunked(a) for a in taps)

    tap_spec = pl.BlockSpec((None, b_blk, Tc), lambda i, j: (j, i, 0))
    wmap = lambda i, j: (0, 0)                          # weights: resident, fetched once

    # VMEM budget: xg slab + conv temporaries + double-buffered taps + margin.
    xg_bytes = b_blk * Tc * GATES * 4
    vmem_limit = int(min(64 << 20,
                         max(16 << 20,
                             4 * xg_bytes
                             + 8 * b_blk * Tc * 4
                             + 4 * b_blk * Tc * C_CONV * 4
                             + (2 << 20))))

    cost = pl.CostEstimate(
        flops=int(2 * B * T * (6 * C_CONV + C_CONV * GATES + HID * GATES)
                  + 2 * B * (HID * FC1 + FC1 * NC_PAD)),
        transcendentals=int(B * T * (GATES + HID)),
        bytes_accessed=int(4 * 4 * B * T + 4 * B * NC_PAD
                           + 2 * (C_CONV * GATES + HID * GATES + HID * FC1 + FC1 * NC_PAD)
                           + 4 * (3 * C_CONV + C_CONV + GATES + FC1 + NC_PAD)),
    )

    out_pad = pl.pallas_call(
        cnn_lstm_kernel,
        out_shape=jax.ShapeDtypeStruct((B, NC_PAD), jnp.float32),
        grid=grid,
        in_specs=[
            tap_spec, tap_spec, tap_spec, tap_spec,          # conv/pool taps (chunked)
            pl.BlockSpec((3, C_CONV), wmap),                 # conv w
            pl.BlockSpec((1, C_CONV), wmap),                 # conv b
            pl.BlockSpec((C_CONV, GATES), wmap),             # w_ih^T (bf16, g-band *2)
            pl.BlockSpec((1, GATES), wmap),                  # b_ih + b_hh (g-band *2)
            pl.BlockSpec((HID, GATES), wmap),                # w_hh^T (bf16, g-band *2)
            pl.BlockSpec((HID, FC1), wmap),                  # fc1 w^T (bf16)
            pl.BlockSpec((1, FC1), wmap),                    # fc1 b
            pl.BlockSpec((FC1, NC_PAD), wmap),               # fc2 w^T (bf16, padded)
            pl.BlockSpec((1, NC_PAD), wmap),                 # fc2 b   (padded)
        ],
        out_specs=pl.BlockSpec((b_blk, NC_PAD), lambda i, j: (i, 0)),
        scratch_shapes=[pltpu.VMEM((b_blk, HID), jnp.float32),   # h carry
                        pltpu.VMEM((b_blk, HID), jnp.float32)],  # c carry
        compiler_params=pltpu.CompilerParams(
            dimension_semantics=("parallel", "arbitrary"),
            vmem_limit_bytes=vmem_limit),
        cost_estimate=cost,
    )(*taps_c, packed["cw"], packed["cb"], packed["wih"], packed["bl"],
      packed["whh"], packed["w1"], packed["b1"], packed["w2"], packed["b2"])

    return out_pad[:, :NUM_CLASSES]


if __name__ == "__main__":
    key = jax.random.PRNGKey(0)
    pkey, xkey = jax.random.split(key)
    params = init_params(pkey)
    packed = pack_params(params)                         # layout prep done once

    B, L = 2, 16                                         # input (B, 1, L); seq after pool = 8
    x = jax.random.normal(xkey, (B, 1, L), jnp.float32)

    out = jax.jit(cnn_lstm_forward)(x, packed)
    jax.block_until_ready(out)
    assert out.shape == (B, NUM_CLASSES) and out.dtype == jnp.float32
    print("KERNEL_OK")
</pallas_src>

<mosaic_0001>
module attributes {stable_mosaic.version = 11 : i64} {
  func.func @cnn_lstm_kernel(%arg0: i32, %arg1: i32, %arg2: memref<1x2x8xf32, #tpu.memory_space<vmem>>, %arg3: memref<1x2x8xf32, #tpu.memory_space<vmem>>, %arg4: memref<1x2x8xf32, #tpu.memory_space<vmem>>, %arg5: memref<1x2x8xf32, #tpu.memory_space<vmem>>, %arg6: memref<3x16xf32, #tpu.memory_space<vmem>>, %arg7: memref<1x16xf32, #tpu.memory_space<vmem>>, %arg8: memref<16x128xbf16, #tpu.memory_space<vmem>>, %arg9: memref<1x128xf32, #tpu.memory_space<vmem>>, %arg10: memref<32x128xbf16, #tpu.memory_space<vmem>>, %arg11: memref<32x64xbf16, #tpu.memory_space<vmem>>, %arg12: memref<1x64xf32, #tpu.memory_space<vmem>>, %arg13: memref<64x128xbf16, #tpu.memory_space<vmem>>, %arg14: memref<1x128xf32, #tpu.memory_space<vmem>>, %arg15: memref<2x128xf32, #tpu.memory_space<vmem>>, %arg16: memref<2x32xf32, #tpu.memory_space<vmem>>, %arg17: memref<2x32xf32, #tpu.memory_space<vmem>>) attributes {dimension_semantics = [#tpu.dimension_semantics<parallel>, #tpu.dimension_semantics<arbitrary>], iteration_bounds = array<i64: 1, 1>, scalar_prefetch = 0 : i64, scratch_operands = 2 : i64, tpu.core_type = #tpu.core_type<tc>, window_params = [{transform_indices = @transform_0, window_bounds = array<i64: 1, 2, 8>}, {transform_indices = @transform_1, window_bounds = array<i64: 1, 2, 8>}, {transform_indices = @transform_2, window_bounds = array<i64: 1, 2, 8>}, {transform_indices = @transform_3, window_bounds = array<i64: 1, 2, 8>}, {pipeline_mode = #tpu.pipeline_mode<synchronous>, transform_indices = @transform_4, window_bounds = array<i64: 3, 16>}, {pipeline_mode = #tpu.pipeline_mode<synchronous>, transform_indices = @transform_5, window_bounds = array<i64: 1, 16>}, {pipeline_mode = #tpu.pipeline_mode<synchronous>, transform_indices = @transform_6, window_bounds = array<i64: 16, 128>}, {pipeline_mode = #tpu.pipeline_mode<synchronous>, transform_indices = @transform_7, window_bounds = array<i64: 1, 128>}, {pipeline_mode = #tpu.pipeline_mode<synchronous>, transform_indices = @transform_8, window_bounds = array<i64: 32, 128>}, {pipeline_mode = #tpu.pipeline_mode<synchronous>, transform_indices = @transform_9, window_bounds = array<i64: 32, 64>}, {pipeline_mode = #tpu.pipeline_mode<synchronous>, transform_indices = @transform_10, window_bounds = array<i64: 1, 64>}, {pipeline_mode = #tpu.pipeline_mode<synchronous>, transform_indices = @transform_11, window_bounds = array<i64: 64, 128>}, {pipeline_mode = #tpu.pipeline_mode<synchronous>, transform_indices = @transform_12, window_bounds = array<i64: 1, 128>}, {transform_indices = @transform_13, window_bounds = array<i64: 2, 128>}]} {
    %c0_i32 = arith.constant 0 : i32
    %0 = arith.cmpi eq, %arg1, %c0_i32 : i32
    %1 = arith.extui %0 : i1 to i32
    %c0_i32_0 = arith.constant 0 : i32
    %2 = arith.cmpi ne, %1, %c0_i32_0 : i32
    scf.if %2 {
      %cst_82 = arith.constant 0.000000e+00 : f32
      %302 = vector.broadcast %cst_82 : f32 to vector<2x32xf32>
      %c0_83 = arith.constant 0 : index
      %c0_84 = arith.constant 0 : index
      %303 = vector.load %arg16[%c0_83, %c0_84] : memref<2x32xf32, #tpu.memory_space<vmem>>, vector<2x32xf32>
      tpu.vector_store %arg16[%c0_83, %c0_84], %302 {strides = array<i32>} : memref<2x32xf32, #tpu.memory_space<vmem>>, vector<2x32xf32>,
      %cst_85 = arith.constant 0.000000e+00 : f32
      %304 = vector.broadcast %cst_85 : f32 to vector<2x32xf32>
      %c0_86 = arith.constant 0 : index
      %c0_87 = arith.constant 0 : index
      %305 = vector.load %arg17[%c0_86, %c0_87] : memref<2x32xf32, #tpu.memory_space<vmem>>, vector<2x32xf32>
      tpu.vector_store %arg17[%c0_86, %c0_87], %304 {strides = array<i32>} : memref<2x32xf32, #tpu.memory_space<vmem>>, vector<2x32xf32>,
    } else {
    }
    %c0 = arith.constant 0 : index
    %c0_1 = arith.constant 0 : index
    %c0_2 = arith.constant 0 : index
    %3 = vector.load %arg2[%c0, %c0_1, %c0_2] : memref<1x2x8xf32, #tpu.memory_space<vmem>>, vector<1x2x8xf32>
    %4 = vector.shape_cast %3 : vector<1x2x8xf32> to vector<2x8xf32>
    %c0_3 = arith.constant 0 : index
    %c0_4 = arith.constant 0 : index
    %c0_5 = arith.constant 0 : index
    %5 = vector.load %arg3[%c0_3, %c0_4, %c0_5] : memref<1x2x8xf32, #tpu.memory_space<vmem>>, vector<1x2x8xf32>
    %6 = vector.shape_cast %5 : vector<1x2x8xf32> to vector<2x8xf32>
    %c0_6 = arith.constant 0 : index
    %c0_7 = arith.constant 0 : index
    %c0_8 = arith.constant 0 : index
    %7 = vector.load %arg4[%c0_6, %c0_7, %c0_8] : memref<1x2x8xf32, #tpu.memory_space<vmem>>, vector<1x2x8xf32>
    %8 = vector.shape_cast %7 : vector<1x2x8xf32> to vector<2x8xf32>
    %c0_9 = arith.constant 0 : index
    %c0_10 = arith.constant 0 : index
    %c0_11 = arith.constant 0 : index
    %9 = vector.load %arg5[%c0_9, %c0_10, %c0_11] : memref<1x2x8xf32, #tpu.memory_space<vmem>>, vector<1x2x8xf32>
    %10 = vector.shape_cast %9 : vector<1x2x8xf32> to vector<2x8xf32>
    %c0_12 = arith.constant 0 : index
    %c0_13 = arith.constant 0 : index
    %11 = vector.load %arg6[%c0_12, %c0_13] : memref<3x16xf32, #tpu.memory_space<vmem>>, vector<3x16xf32>
    %c0_14 = arith.constant 0 : index
    %c0_15 = arith.constant 0 : index
    %12 = vector.load %arg7[%c0_14, %c0_15] : memref<1x16xf32, #tpu.memory_space<vmem>>, vector<1x16xf32>
    %13 = vector.shape_cast %4 : vector<2x8xf32> to vector<2x8x1xf32>
    %14 = vector.extract_strided_slice %11 {offsets = [0, 0], sizes = [1, 16], strides = [1, 1]} : vector<3x16xf32> to vector<1x16xf32>
    %15 = vector.shape_cast %14 : vector<1x16xf32> to vector<1x1x16xf32>
    %16 = vector.broadcast %13 : vector<2x8x1xf32> to vector<2x8x16xf32>
    %17 = vector.broadcast %15 : vector<1x1x16xf32> to vector<2x8x16xf32>
    %18 = arith.mulf %16, %17 : vector<2x8x16xf32>
    %19 = vector.shape_cast %6 : vector<2x8xf32> to vector<2x8x1xf32>
    %20 = vector.extract_strided_slice %11 {offsets = [1, 0], sizes = [1, 16], strides = [1, 1]} : vector<3x16xf32> to vector<1x16xf32>
    %21 = vector.shape_cast %20 : vector<1x16xf32> to vector<1x1x16xf32>
    %22 = vector.broadcast %19 : vector<2x8x1xf32> to vector<2x8x16xf32>
    %23 = vector.broadcast %21 : vector<1x1x16xf32> to vector<2x8x16xf32>
    %24 = arith.mulf %22, %23 : vector<2x8x16xf32>
    %25 = arith.addf %18, %24 : vector<2x8x16xf32>
    %26 = vector.shape_cast %8 : vector<2x8xf32> to vector<2x8x1xf32>
    %27 = vector.extract_strided_slice %11 {offsets = [2, 0], sizes = [1, 16], strides = [1, 1]} : vector<3x16xf32> to vector<1x16xf32>
    %28 = vector.shape_cast %27 : vector<1x16xf32> to vector<1x1x16xf32>
    %29 = vector.broadcast %26 : vector<2x8x1xf32> to vector<2x8x16xf32>
    %30 = vector.broadcast %28 : vector<1x1x16xf32> to vector<2x8x16xf32>
    %31 = arith.mulf %29, %30 : vector<2x8x16xf32>
    %32 = arith.addf %25, %31 : vector<2x8x16xf32>
    %33 = vector.shape_cast %12 : vector<1x16xf32> to vector<1x1x16xf32>
    %34 = vector.broadcast %33 : vector<1x1x16xf32> to vector<2x8x16xf32>
    %35 = arith.addf %32, %34 : vector<2x8x16xf32>
    %cst = arith.constant 0.000000e+00 : f32
    %36 = vector.broadcast %cst : f32 to vector<2x8x16xf32>
    %37 = arith.maximumf %35, %36 : vector<2x8x16xf32>
    %38 = vector.shape_cast %6 : vector<2x8xf32> to vector<2x8x1xf32>
    %39 = vector.extract_strided_slice %11 {offsets = [0, 0], sizes = [1, 16], strides = [1, 1]} : vector<3x16xf32> to vector<1x16xf32>
    %40 = vector.shape_cast %39 : vector<1x16xf32> to vector<1x1x16xf32>
    %41 = vector.broadcast %38 : vector<2x8x1xf32> to vector<2x8x16xf32>
    %42 = vector.broadcast %40 : vector<1x1x16xf32> to vector<2x8x16xf32>
    %43 = arith.mulf %41, %42 : vector<2x8x16xf32>
    %44 = vector.shape_cast %8 : vector<2x8xf32> to vector<2x8x1xf32>
    %45 = vector.extract_strided_slice %11 {offsets = [1, 0], sizes = [1, 16], strides = [1, 1]} : vector<3x16xf32> to vector<1x16xf32>
    %46 = vector.shape_cast %45 : vector<1x16xf32> to vector<1x1x16xf32>
    %47 = vector.broadcast %44 : vector<2x8x1xf32> to vector<2x8x16xf32>
    %48 = vector.broadcast %46 : vector<1x1x16xf32> to vector<2x8x16xf32>
    %49 = arith.mulf %47, %48 : vector<2x8x16xf32>
    %50 = arith.addf %43, %49 : vector<2x8x16xf32>
    %51 = vector.shape_cast %10 : vector<2x8xf32> to vector<2x8x1xf32>
    %52 = vector.extract_strided_slice %11 {offsets = [2, 0], sizes = [1, 16], strides = [1, 1]} : vector<3x16xf32> to vector<1x16xf32>
    %53 = vector.shape_cast %52 : vector<1x16xf32> to vector<1x1x16xf32>
    %54 = vector.broadcast %51 : vector<2x8x1xf32> to vector<2x8x16xf32>
    %55 = vector.broadcast %53 : vector<1x1x16xf32> to vector<2x8x16xf32>
    %56 = arith.mulf %54, %55 : vector<2x8x16xf32>
    %57 = arith.addf %50, %56 : vector<2x8x16xf32>
    %58 = vector.shape_cast %12 : vector<1x16xf32> to vector<1x1x16xf32>
    %59 = vector.broadcast %58 : vector<1x1x16xf32> to vector<2x8x16xf32>
    %60 = arith.addf %57, %59 : vector<2x8x16xf32>
    %cst_16 = arith.constant 0.000000e+00 : f32
    %61 = vector.broadcast %cst_16 : f32 to vector<2x8x16xf32>
    %62 = arith.maximumf %60, %61 : vector<2x8x16xf32>
    %63 = arith.maximumf %37, %62 : vector<2x8x16xf32>
    %64 = vector.shape_cast %63 : vector<2x8x16xf32> to vector<16x16xf32>
    %65 = arith.truncf %64 : vector<16x16xf32> to vector<16x16xbf16>
    %c0_17 = arith.constant 0 : index
    %c0_18 = arith.constant 0 : index
    %66 = vector.load %arg8[%c0_17, %c0_18] : memref<16x128xbf16, #tpu.memory_space<vmem>>, vector<16x128xbf16>
    %cst_19 = arith.constant dense<0.000000e+00> : vector<16x128xf32>
    %67 = tpu.matmul %65, %66, %cst_19 {dimension_numbers = #tpu.dot_dimension_numbers<[1], [0], [0], [1], [0, 0, 1, 1], [], []>} : vector<16x16xbf16>, vector<16x128xbf16>, vector<16x128xf32> -> vector<16x128xf32>
    %c0_20 = arith.constant 0 : index
    %c0_21 = arith.constant 0 : index
    %68 = vector.load %arg9[%c0_20, %c0_21] : memref<1x128xf32, #tpu.memory_space<vmem>>, vector<1x128xf32>
    %69 = vector.broadcast %68 : vector<1x128xf32> to vector<16x128xf32>
    %70 = arith.addf %67, %69 : vector<16x128xf32>
    %71 = vector.shape_cast %70 : vector<16x128xf32> to vector<2x8x128xf32>
    %c0_22 = arith.constant 0 : index
    %c0_23 = arith.constant 0 : index
    %72 = vector.load %arg10[%c0_22, %c0_23] : memref<32x128xbf16, #tpu.memory_space<vmem>>, vector<32x128xbf16>
    %73 = tpu.iota {dimensions = array<i32: 1>} : vector<2x128xi32>
    %c64_i32 = arith.constant 64 : i32
    %74 = vector.broadcast %c64_i32 : i32 to vector<2x128xi32>
    %75 = arith.cmpi sge, %73, %74 : vector<2x128xi32>
    %c96_i32 = arith.constant 96 : i32
    %76 = vector.broadcast %c96_i32 : i32 to vector<2x128xi32>
    %77 = arith.cmpi slt, %73, %76 : vector<2x128xi32>
    %78 = arith.andi %75, %77 : vector<2x128xi1>
    %c0_24 = arith.constant 0 : index
    %c0_25 = arith.constant 0 : index
    %79 = vector.load %arg16[%c0_24, %c0_25] : memref<2x32xf32, #tpu.memory_space<vmem>>, vector<2x32xf32>
    %c0_26 = arith.constant 0 : index
    %c0_27 = arith.constant 0 : index
    %80 = vector.load %arg17[%c0_26, %c0_27] : memref<2x32xf32, #tpu.memory_space<vmem>>, vector<2x32xf32>
    %81 = vector.extract_strided_slice %71 {offsets = [0, 0, 0], sizes = [2, 1, 128], strides = [1, 1, 1]} : vector<2x8x128xf32> to vector<2x1x128xf32>
    %82 = vector.shape_cast %81 : vector<2x1x128xf32> to vector<2x128xf32>
    %83 = arith.truncf %79 : vector<2x32xf32> to vector<2x32xbf16>
    %cst_28 = arith.constant dense<0.000000e+00> : vector<2x128xf32>
    %84 = tpu.matmul %83, %72, %cst_28 {dimension_numbers = #tpu.dot_dimension_numbers<[1], [0], [0], [1], [0, 0, 1, 1], [], []>} : vector<2x32xbf16>, vector<32x128xbf16>, vector<2x128xf32> -> vector<2x128xf32>
    %85 = arith.addf %82, %84 : vector<2x128xf32>
    %cst_29 = arith.constant -6.000000e+01 : f32
    %86 = vector.broadcast %cst_29 : f32 to vector<2x128xf32>
    %87 = arith.maximumf %85, %86 : vector<2x128xf32>
    %cst_30 = arith.constant 0.000000e+00 : f32
    %88 = vector.broadcast %cst_30 : f32 to vector<2x128xf32>
    %89 = arith.subf %88, %87 : vector<2x128xf32>
    %90 = math.exp %89 : vector<2x128xf32>
    %cst_31 = arith.constant 1.000000e+00 : f32
    %91 = vector.broadcast %cst_31 : f32 to vector<2x128xf32>
    %92 = arith.addf %91, %90 : vector<2x128xf32>
    %93 = tpu.reciprocal %92 {approx = true} : vector<2x128xf32> -> vector<2x128xf32>
    %cst_32 = arith.constant 2.000000e+00 : f32
    %94 = vector.broadcast %cst_32 : f32 to vector<2x128xf32>
    %95 = arith.mulf %94, %93 : vector<2x128xf32>
    %cst_33 = arith.constant 1.000000e+00 : f32
    %96 = vector.broadcast %cst_33 : f32 to vector<2x128xf32>
    %97 = arith.subf %95, %96 : vector<2x128xf32>
    %98 = arith.select %78, %97, %93 : vector<2x128xi1>, vector<2x128xf32>
    %99 = vector.extract_strided_slice %98 {offsets = [0, 0], sizes = [2, 32], strides = [1, 1]} : vector<2x128xf32> to vector<2x32xf32>
    %100 = vector.extract_strided_slice %98 {offsets = [0, 32], sizes = [2, 32], strides = [1, 1]} : vector<2x128xf32> to vector<2x32xf32>
    %101 = vector.extract_strided_slice %98 {offsets = [0, 64], sizes = [2, 32], strides = [1, 1]} : vector<2x128xf32> to vector<2x32xf32>
    %102 = vector.extract_strided_slice %98 {offsets = [0, 96], sizes = [2, 32], strides = [1, 1]} : vector<2x128xf32> to vector<2x32xf32>
    %103 = arith.mulf %100, %80 : vector<2x32xf32>
    %104 = arith.mulf %99, %101 : vector<2x32xf32>
    %105 = arith.addf %103, %104 : vector<2x32xf32>
    %106 = math.tanh %105 : vector<2x32xf32>
    %107 = arith.mulf %102, %106 : vector<2x32xf32>
    %108 = vector.extract_strided_slice %71 {offsets = [0, 1, 0], sizes = [2, 1, 128], strides = [1, 1, 1]} : vector<2x8x128xf32> to vector<2x1x128xf32>
    %109 = vector.shape_cast %108 : vector<2x1x128xf32> to vector<2x128xf32>
    %110 = arith.truncf %107 : vector<2x32xf32> to vector<2x32xbf16>
    %cst_34 = arith.constant dense<0.000000e+00> : vector<2x128xf32>
    %111 = tpu.matmul %110, %72, %cst_34 {dimension_numbers = #tpu.dot_dimension_numbers<[1], [0], [0], [1], [0, 0, 1, 1], [], []>} : vector<2x32xbf16>, vector<32x128xbf16>, vector<2x128xf32> -> vector<2x128xf32>
    %112 = arith.addf %109, %111 : vector<2x128xf32>
    %cst_35 = arith.constant -6.000000e+01 : f32
    %113 = vector.broadcast %cst_35 : f32 to vector<2x128xf32>
    %114 = arith.maximumf %112, %113 : vector<2x128xf32>
    %cst_36 = arith.constant 0.000000e+00 : f32
    %115 = vector.broadcast %cst_36 : f32 to vector<2x128xf32>
    %116 = arith.subf %115, %114 : vector<2x128xf32>
    %117 = math.exp %116 : vector<2x128xf32>
    %cst_37 = arith.constant 1.000000e+00 : f32
    %118 = vector.broadcast %cst_37 : f32 to vector<2x128xf32>
    %119 = arith.addf %118, %117 : vector<2x128xf32>
    %120 = tpu.reciprocal %119 {approx = true} : vector<2x128xf32> -> vector<2x128xf32>
    %cst_38 = arith.constant 2.000000e+00 : f32
    %121 = vector.broadcast %cst_38 : f32 to vector<2x128xf32>
    %122 = arith.mulf %121, %120 : vector<2x128xf32>
    %cst_39 = arith.constant 1.000000e+00 : f32
    %123 = vector.broadcast %cst_39 : f32 to vector<2x128xf32>
    %124 = arith.subf %122, %123 : vector<2x128xf32>
    %125 = arith.select %78, %124, %120 : vector<2x128xi1>, vector<2x128xf32>
    %126 = vector.extract_strided_slice %125 {offsets = [0, 0], sizes = [2, 32], strides = [1, 1]} : vector<2x128xf32> to vector<2x32xf32>
    %127 = vector.extract_strided_slice %125 {offsets = [0, 32], sizes = [2, 32], strides = [1, 1]} : vector<2x128xf32> to vector<2x32xf32>
    %128 = vector.extract_strided_slice %125 {offsets = [0, 64], sizes = [2, 32], strides = [1, 1]} : vector<2x128xf32> to vector<2x32xf32>
    %129 = vector.extract_strided_slice %125 {offsets = [0, 96], sizes = [2, 32], strides = [1, 1]} : vector<2x128xf32> to vector<2x32xf32>
    %130 = arith.mulf %127, %105 : vector<2x32xf32>
    %131 = arith.mulf %126, %128 : vector<2x32xf32>
    %132 = arith.addf %130, %131 : vector<2x32xf32>
    %133 = math.tanh %132 : vector<2x32xf32>
    %134 = arith.mulf %129, %133 : vector<2x32xf32>
    %135 = vector.extract_strided_slice %71 {offsets = [0, 2, 0], sizes = [2, 1, 128], strides = [1, 1, 1]} : vector<2x8x128xf32> to vector<2x1x128xf32>
    %136 = vector.shape_cast %135 : vector<2x1x128xf32> to vector<2x128xf32>
    %137 = arith.truncf %134 : vector<2x32xf32> to vector<2x32xbf16>
    %cst_40 = arith.constant dense<0.000000e+00> : vector<2x128xf32>
    %138 = tpu.matmul %137, %72, %cst_40 {dimension_numbers = #tpu.dot_dimension_numbers<[1], [0], [0], [1], [0, 0, 1, 1], [], []>} : vector<2x32xbf16>, vector<32x128xbf16>, vector<2x128xf32> -> vector<2x128xf32>
    %139 = arith.addf %136, %138 : vector<2x128xf32>
    %cst_41 = arith.constant -6.000000e+01 : f32
    %140 = vector.broadcast %cst_41 : f32 to vector<2x128xf32>
    %141 = arith.maximumf %139, %140 : vector<2x128xf32>
    %cst_42 = arith.constant 0.000000e+00 : f32
    %142 = vector.broadcast %cst_42 : f32 to vector<2x128xf32>
    %143 = arith.subf %142, %141 : vector<2x128xf32>
    %144 = math.exp %143 : vector<2x128xf32>
    %cst_43 = arith.constant 1.000000e+00 : f32
    %145 = vector.broadcast %cst_43 : f32 to vector<2x128xf32>
    %146 = arith.addf %145, %144 : vector<2x128xf32>
    %147 = tpu.reciprocal %146 {approx = true} : vector<2x128xf32> -> vector<2x128xf32>
    %cst_44 = arith.constant 2.000000e+00 : f32
    %148 = vector.broadcast %cst_44 : f32 to vector<2x128xf32>
    %149 = arith.mulf %148, %147 : vector<2x128xf32>
    %cst_45 = arith.constant 1.000000e+00 : f32
    %150 = vector.broadcast %cst_45 : f32 to vector<2x128xf32>
    %151 = arith.subf %149, %150 : vector<2x128xf32>
    %152 = arith.select %78, %151, %147 : vector<2x128xi1>, vector<2x128xf32>
    %153 = vector.extract_strided_slice %152 {offsets = [0, 0], sizes = [2, 32], strides = [1, 1]} : vector<2x128xf32> to vector<2x32xf32>
    %154 = vector.extract_strided_slice %152 {offsets = [0, 32], sizes = [2, 32], strides = [1, 1]} : vector<2x128xf32> to vector<2x32xf32>
    %155 = vector.extract_strided_slice %152 {offsets = [0, 64], sizes = [2, 32], strides = [1, 1]} : vector<2x128xf32> to vector<2x32xf32>
    %156 = vector.extract_strided_slice %152 {offsets = [0, 96], sizes = [2, 32], strides = [1, 1]} : vector<2x128xf32> to vector<2x32xf32>
    %157 = arith.mulf %154, %132 : vector<2x32xf32>
    %158 = arith.mulf %153, %155 : vector<2x32xf32>
    %159 = arith.addf %157, %158 : vector<2x32xf32>
    %160 = math.tanh %159 : vector<2x32xf32>
    %161 = arith.mulf %156, %160 : vector<2x32xf32>
    %162 = vector.extract_strided_slice %71 {offsets = [0, 3, 0], sizes = [2, 1, 128], strides = [1, 1, 1]} : vector<2x8x128xf32> to vector<2x1x128xf32>
    %163 = vector.shape_cast %162 : vector<2x1x128xf32> to vector<2x128xf32>
    %164 = arith.truncf %161 : vector<2x32xf32> to vector<2x32xbf16>
    %cst_46 = arith.constant dense<0.000000e+00> : vector<2x128xf32>
    %165 = tpu.matmul %164, %72, %cst_46 {dimension_numbers = #tpu.dot_dimension_numbers<[1], [0], [0], [1], [0, 0, 1, 1], [], []>} : vector<2x32xbf16>, vector<32x128xbf16>, vector<2x128xf32> -> vector<2x128xf32>
    %166 = arith.addf %163, %165 : vector<2x128xf32>
    %cst_47 = arith.constant -6.000000e+01 : f32
    %167 = vector.broadcast %cst_47 : f32 to vector<2x128xf32>
    %168 = arith.maximumf %166, %167 : vector<2x128xf32>
    %cst_48 = arith.constant 0.000000e+00 : f32
    %169 = vector.broadcast %cst_48 : f32 to vector<2x128xf32>
    %170 = arith.subf %169, %168 : vector<2x128xf32>
    %171 = math.exp %170 : vector<2x128xf32>
    %cst_49 = arith.constant 1.000000e+00 : f32
    %172 = vector.broadcast %cst_49 : f32 to vector<2x128xf32>
    %173 = arith.addf %172, %171 : vector<2x128xf32>
    %174 = tpu.reciprocal %173 {approx = true} : vector<2x128xf32> -> vector<2x128xf32>
    %cst_50 = arith.constant 2.000000e+00 : f32
    %175 = vector.broadcast %cst_50 : f32 to vector<2x128xf32>
    %176 = arith.mulf %175, %174 : vector<2x128xf32>
    %cst_51 = arith.constant 1.000000e+00 : f32
    %177 = vector.broadcast %cst_51 : f32 to vector<2x128xf32>
    %178 = arith.subf %176, %177 : vector<2x128xf32>
    %179 = arith.select %78, %178, %174 : vector<2x128xi1>, vector<2x128xf32>
    %180 = vector.extract_strided_slice %179 {offsets = [0, 0], sizes = [2, 32], strides = [1, 1]} : vector<2x128xf32> to vector<2x32xf32>
    %181 = vector.extract_strided_slice %179 {offsets = [0, 32], sizes = [2, 32], strides = [1, 1]} : vector<2x128xf32> to vector<2x32xf32>
    %182 = vector.extract_strided_slice %179 {offsets = [0, 64], sizes = [2, 32], strides = [1, 1]} : vector<2x128xf32> to vector<2x32xf32>
    %183 = vector.extract_strided_slice %179 {offsets = [0, 96], sizes = [2, 32], strides = [1, 1]} : vector<2x128xf32> to vector<2x32xf32>
    %184 = arith.mulf %181, %159 : vector<2x32xf32>
    %185 = arith.mulf %180, %182 : vector<2x32xf32>
    %186 = arith.addf %184, %185 : vector<2x32xf32>
    %187 = math.tanh %186 : vector<2x32xf32>
    %188 = arith.mulf %183, %187 : vector<2x32xf32>
    %189 = vector.extract_strided_slice %71 {offsets = [0, 4, 0], sizes = [2, 1, 128], strides = [1, 1, 1]} : vector<2x8x128xf32> to vector<2x1x128xf32>
    %190 = vector.shape_cast %189 : vector<2x1x128xf32> to vector<2x128xf32>
    %191 = arith.truncf %188 : vector<2x32xf32> to vector<2x32xbf16>
    %cst_52 = arith.constant dense<0.000000e+00> : vector<2x128xf32>
    %192 = tpu.matmul %191, %72, %cst_52 {dimension_numbers = #tpu.dot_dimension_numbers<[1], [0], [0], [1], [0, 0, 1, 1], [], []>} : vector<2x32xbf16>, vector<32x128xbf16>, vector<2x128xf32> -> vector<2x128xf32>
    %193 = arith.addf %190, %192 : vector<2x128xf32>
    %cst_53 = arith.constant -6.000000e+01 : f32
    %194 = vector.broadcast %cst_53 : f32 to vector<2x128xf32>
    %195 = arith.maximumf %193, %194 : vector<2x128xf32>
    %cst_54 = arith.constant 0.000000e+00 : f32
    %196 = vector.broadcast %cst_54 : f32 to vector<2x128xf32>
    %197 = arith.subf %196, %195 : vector<2x128xf32>
    %198 = math.exp %197 : vector<2x128xf32>
    %cst_55 = arith.constant 1.000000e+00 : f32
    %199 = vector.broadcast %cst_55 : f32 to vector<2x128xf32>
    %200 = arith.addf %199, %198 : vector<2x128xf32>
    %201 = tpu.reciprocal %200 {approx = true} : vector<2x128xf32> -> vector<2x128xf32>
    %cst_56 = arith.constant 2.000000e+00 : f32
    %202 = vector.broadcast %cst_56 : f32 to vector<2x128xf32>
    %203 = arith.mulf %202, %201 : vector<2x128xf32>
    %cst_57 = arith.constant 1.000000e+00 : f32
    %204 = vector.broadcast %cst_57 : f32 to vector<2x128xf32>
    %205 = arith.subf %203, %204 : vector<2x128xf32>
    %206 = arith.select %78, %205, %201 : vector<2x128xi1>, vector<2x128xf32>
    %207 = vector.extract_strided_slice %206 {offsets = [0, 0], sizes = [2, 32], strides = [1, 1]} : vector<2x128xf32> to vector<2x32xf32>
    %208 = vector.extract_strided_slice %206 {offsets = [0, 32], sizes = [2, 32], strides = [1, 1]} : vector<2x128xf32> to vector<2x32xf32>
    %209 = vector.extract_strided_slice %206 {offsets = [0, 64], sizes = [2, 32], strides = [1, 1]} : vector<2x128xf32> to vector<2x32xf32>
    %210 = vector.extract_strided_slice %206 {offsets = [0, 96], sizes = [2, 32], strides = [1, 1]} : vector<2x128xf32> to vector<2x32xf32>
    %211 = arith.mulf %208, %186 : vector<2x32xf32>
    %212 = arith.mulf %207, %209 : vector<2x32xf32>
    %213 = arith.addf %211, %212 : vector<2x32xf32>
    %214 = math.tanh %213 : vector<2x32xf32>
    %215 = arith.mulf %210, %214 : vector<2x32xf32>
    %216 = vector.extract_strided_slice %71 {offsets = [0, 5, 0], sizes = [2, 1, 128], strides = [1, 1, 1]} : vector<2x8x128xf32> to vector<2x1x128xf32>
    %217 = vector.shape_cast %216 : vector<2x1x128xf32> to vector<2x128xf32>
    %218 = arith.truncf %215 : vector<2x32xf32> to vector<2x32xbf16>
    %cst_58 = arith.constant dense<0.000000e+00> : vector<2x128xf32>
    %219 = tpu.matmul %218, %72, %cst_58 {dimension_numbers = #tpu.dot_dimension_numbers<[1], [0], [0], [1], [0, 0, 1, 1], [], []>} : vector<2x32xbf16>, vector<32x128xbf16>, vector<2x128xf32> -> vector<2x128xf32>
    %220 = arith.addf %217, %219 : vector<2x128xf32>
    %cst_59 = arith.constant -6.000000e+01 : f32
    %221 = vector.broadcast %cst_59 : f32 to vector<2x128xf32>
    %222 = arith.maximumf %220, %221 : vector<2x128xf32>
    %cst_60 = arith.constant 0.000000e+00 : f32
    %223 = vector.broadcast %cst_60 : f32 to vector<2x128xf32>
    %224 = arith.subf %223, %222 : vector<2x128xf32>
    %225 = math.exp %224 : vector<2x128xf32>
    %cst_61 = arith.constant 1.000000e+00 : f32
    %226 = vector.broadcast %cst_61 : f32 to vector<2x128xf32>
    %227 = arith.addf %226, %225 : vector<2x128xf32>
    %228 = tpu.reciprocal %227 {approx = true} : vector<2x128xf32> -> vector<2x128xf32>
    %cst_62 = arith.constant 2.000000e+00 : f32
    %229 = vector.broadcast %cst_62 : f32 to vector<2x128xf32>
    %230 = arith.mulf %229, %228 : vector<2x128xf32>
    %cst_63 = arith.constant 1.000000e+00 : f32
    %231 = vector.broadcast %cst_63 : f32 to vector<2x128xf32>
    %232 = arith.subf %230, %231 : vector<2x128xf32>
    %233 = arith.select %78, %232, %228 : vector<2x128xi1>, vector<2x128xf32>
    %234 = vector.extract_strided_slice %233 {offsets = [0, 0], sizes = [2, 32], strides = [1, 1]} : vector<2x128xf32> to vector<2x32xf32>
    %235 = vector.extract_strided_slice %233 {offsets = [0, 32], sizes = [2, 32], strides = [1, 1]} : vector<2x128xf32> to vector<2x32xf32>
    %236 = vector.extract_strided_slice %233 {offsets = [0, 64], sizes = [2, 32], strides = [1, 1]} : vector<2x128xf32> to vector<2x32xf32>
    %237 = vector.extract_strided_slice %233 {offsets = [0, 96], sizes = [2, 32], strides = [1, 1]} : vector<2x128xf32> to vector<2x32xf32>
    %238 = arith.mulf %235, %213 : vector<2x32xf32>
    %239 = arith.mulf %234, %236 : vector<2x32xf32>
    %240 = arith.addf %238, %239 : vector<2x32xf32>
    %241 = math.tanh %240 : vector<2x32xf32>
    %242 = arith.mulf %237, %241 : vector<2x32xf32>
    %243 = vector.extract_strided_slice %71 {offsets = [0, 6, 0], sizes = [2, 1, 128], strides = [1, 1, 1]} : vector<2x8x128xf32> to vector<2x1x128xf32>
    %244 = vector.shape_cast %243 : vector<2x1x128xf32> to vector<2x128xf32>
    %245 = arith.truncf %242 : vector<2x32xf32> to vector<2x32xbf16>
    %cst_64 = arith.constant dense<0.000000e+00> : vector<2x128xf32>
    %246 = tpu.matmul %245, %72, %cst_64 {dimension_numbers = #tpu.dot_dimension_numbers<[1], [0], [0], [1], [0, 0, 1, 1], [], []>} : vector<2x32xbf16>, vector<32x128xbf16>, vector<2x128xf32> -> vector<2x128xf32>
    %247 = arith.addf %244, %246 : vector<2x128xf32>
    %cst_65 = arith.constant -6.000000e+01 : f32
    %248 = vector.broadcast %cst_65 : f32 to vector<2x128xf32>
    %249 = arith.maximumf %247, %248 : vector<2x128xf32>
    %cst_66 = arith.constant 0.000000e+00 : f32
    %250 = vector.broadcast %cst_66 : f32 to vector<2x128xf32>
    %251 = arith.subf %250, %249 : vector<2x128xf32>
    %252 = math.exp %251 : vector<2x128xf32>
    %cst_67 = arith.constant 1.000000e+00 : f32
    %253 = vector.broadcast %cst_67 : f32 to vector<2x128xf32>
    %254 = arith.addf %253, %252 : vector<2x128xf32>
    %255 = tpu.reciprocal %254 {approx = true} : vector<2x128xf32> -> vector<2x128xf32>
    %cst_68 = arith.constant 2.000000e+00 : f32
    %256 = vector.broadcast %cst_68 : f32 to vector<2x128xf32>
    %257 = arith.mulf %256, %255 : vector<2x128xf32>
    %cst_69 = arith.constant 1.000000e+00 : f32
    %258 = vector.broadcast %cst_69 : f32 to vector<2x128xf32>
    %259 = arith.subf %257, %258 : vector<2x128xf32>
    %260 = arith.select %78, %259, %255 : vector<2x128xi1>, vector<2x128xf32>
    %261 = vector.extract_strided_slice %260 {offsets = [0, 0], sizes = [2, 32], strides = [1, 1]} : vector<2x128xf32> to vector<2x32xf32>
    %262 = vector.extract_strided_slice %260 {offsets = [0, 32], sizes = [2, 32], strides = [1, 1]} : vector<2x128xf32> to vector<2x32xf32>
    %263 = vector.extract_strided_slice %260 {offsets = [0, 64], sizes = [2, 32], strides = [1, 1]} : vector<2x128xf32> to vector<2x32xf32>
    %264 = vector.extract_strided_slice %260 {offsets = [0, 96], sizes = [2, 32], strides = [1, 1]} : vector<2x128xf32> to vector<2x32xf32>
    %265 = arith.mulf %262, %240 : vector<2x32xf32>
    %266 = arith.mulf %261, %263 : vector<2x32xf32>
    %267 = arith.addf %265, %266 : vector<2x32xf32>
    %268 = math.tanh %267 : vector<2x32xf32>
    %269 = arith.mulf %264, %268 : vector<2x32xf32>
    %270 = vector.extract_strided_slice %71 {offsets = [0, 7, 0], sizes = [2, 1, 128], strides = [1, 1, 1]} : vector<2x8x128xf32> to vector<2x1x128xf32>
    %271 = vector.shape_cast %270 : vector<2x1x128xf32> to vector<2x128xf32>
    %272 = arith.truncf %269 : vector<2x32xf32> to vector<2x32xbf16>
    %cst_70 = arith.constant dense<0.000000e+00> : vector<2x128xf32>
    %273 = tpu.matmul %272, %72, %cst_70 {dimension_numbers = #tpu.dot_dimension_numbers<[1], [0], [0], [1], [0, 0, 1, 1], [], []>} : vector<2x32xbf16>, vector<32x128xbf16>, vector<2x128xf32> -> vector<2x128xf32>
    %274 = arith.addf %271, %273 : vector<2x128xf32>
    %cst_71 = arith.constant -6.000000e+01 : f32
    %275 = vector.broadcast %cst_71 : f32 to vector<2x128xf32>
    %276 = arith.maximumf %274, %275 : vector<2x128xf32>
    %cst_72 = arith.constant 0.000000e+00 : f32
    %277 = vector.broadcast %cst_72 : f32 to vector<2x128xf32>
    %278 = arith.subf %277, %276 : vector<2x128xf32>
    %279 = math.exp %278 : vector<2x128xf32>
    %cst_73 = arith.constant 1.000000e+00 : f32
    %280 = vector.broadcast %cst_73 : f32 to vector<2x128xf32>
    %281 = arith.addf %280, %279 : vector<2x128xf32>
    %282 = tpu.reciprocal %281 {approx = true} : vector<2x128xf32> -> vector<2x128xf32>
    %cst_74 = arith.constant 2.000000e+00 : f32
    %283 = vector.broadcast %cst_74 : f32 to vector<2x128xf32>
    %284 = arith.mulf %283, %282 : vector<2x128xf32>
    %cst_75 = arith.constant 1.000000e+00 : f32
    %285 = vector.broadcast %cst_75 : f32 to vector<2x128xf32>
    %286 = arith.subf %284, %285 : vector<2x128xf32>
    %287 = arith.select %78, %286, %282 : vector<2x128xi1>, vector<2x128xf32>
    %288 = vector.extract_strided_slice %287 {offsets = [0, 0], sizes = [2, 32], strides = [1, 1]} : vector<2x128xf32> to vector<2x32xf32>
    %289 = vector.extract_strided_slice %287 {offsets = [0, 32], sizes = [2, 32], strides = [1, 1]} : vector<2x128xf32> to vector<2x32xf32>
    %290 = vector.extract_strided_slice %287 {offsets = [0, 64], sizes = [2, 32], strides = [1, 1]} : vector<2x128xf32> to vector<2x32xf32>
    %291 = vector.extract_strided_slice %287 {offsets = [0, 96], sizes = [2, 32], strides = [1, 1]} : vector<2x128xf32> to vector<2x32xf32>
    %292 = arith.mulf %289, %267 : vector<2x32xf32>
    %293 = arith.mulf %288, %290 : vector<2x32xf32>
    %294 = arith.addf %292, %293 : vector<2x32xf32>
    %295 = math.tanh %294 : vector<2x32xf32>
    %296 = arith.mulf %291, %295 : vector<2x32xf32>
    %c0_76 = arith.constant 0 : index
    %c0_77 = arith.constant 0 : index
    %297 = vector.load %arg16[%c0_76, %c0_77] : memref<2x32xf32, #tpu.memory_space<vmem>>, vector<2x32xf32>
    tpu.vector_store %arg16[%c0_76, %c0_77], %296 {strides = array<i32>} : memref<2x32xf32, #tpu.memory_space<vmem>>, vector<2x32xf32>,
    %c0_78 = arith.constant 0 : index
    %c0_79 = arith.constant 0 : index
    %298 = vector.load %arg17[%c0_78, %c0_79] : memref<2x32xf32, #tpu.memory_space<vmem>>, vector<2x32xf32>
    tpu.vector_store %arg17[%c0_78, %c0_79], %294 {strides = array<i32>} : memref<2x32xf32, #tpu.memory_space<vmem>>, vector<2x32xf32>,
    %c0_i32_80 = arith.constant 0 : i32
    %299 = arith.cmpi eq, %arg1, %c0_i32_80 : i32
    %300 = arith.extui %299 : i1 to i32
    %c0_i32_81 = arith.constant 0 : i32
    %301 = arith.cmpi ne, %300, %c0_i32_81 : i32
    scf.if %301 {
      %302 = arith.truncf %296 : vector<2x32xf32> to vector<2x32xbf16>
      %c0_82 = arith.constant 0 : index
      %c0_83 = arith.constant 0 : index
      %303 = vector.load %arg11[%c0_82, %c0_83] : memref<32x64xbf16, #tpu.memory_space<vmem>>, vector<32x64xbf16>
      %cst_84 = arith.constant dense<0.000000e+00> : vector<2x64xf32>
      %304 = tpu.matmul %302, %303, %cst_84 {dimension_numbers = #tpu.dot_dimension_numbers<[1], [0], [0], [1], [0, 0, 1, 1], [], []>} : vector<2x32xbf16>, vector<32x64xbf16>, vector<2x64xf32> -> vector<2x64xf32>
      %c0_85 = arith.constant 0 : index
      %c0_86 = arith.constant 0 : index
      %305 = vector.load %arg12[%c0_85, %c0_86] : memref<1x64xf32, #tpu.memory_space<vmem>>, vector<1x64xf32>
      %306 = vector.broadcast %305 : vector<1x64xf32> to vector<2x64xf32>
      %307 = arith.addf %304, %306 : vector<2x64xf32>
      %cst_87 = arith.constant 0.000000e+00 : f32
      %308 = vector.broadcast %cst_87 : f32 to vector<2x64xf32>
      %309 = arith.maximumf %307, %308 : vector<2x64xf32>
      %310 = arith.truncf %309 : vector<2x64xf32> to vector<2x64xbf16>
      %c0_88 = arith.constant 0 : index
      %c0_89 = arith.constant 0 : index
      %311 = vector.load %arg13[%c0_88, %c0_89] : memref<64x128xbf16, #tpu.memory_space<vmem>>, vector<64x128xbf16>
      %cst_90 = arith.constant dense<0.000000e+00> : vector<2x128xf32>
      %312 = tpu.matmul %310, %311, %cst_90 {dimension_numbers = #tpu.dot_dimension_numbers<[1], [0], [0], [1], [0, 0, 1, 1], [], []>} : vector<2x64xbf16>, vector<64x128xbf16>, vector<2x128xf32> -> vector<2x128xf32>
      %c0_91 = arith.constant 0 : index
      %c0_92 = arith.constant 0 : index
      %313 = vector.load %arg14[%c0_91, %c0_92] : memref<1x128xf32, #tpu.memory_space<vmem>>, vector<1x128xf32>
      %314 = vector.broadcast %313 : vector<1x128xf32> to vector<2x128xf32>
      %315 = arith.addf %312, %314 : vector<2x128xf32>
      %c0_93 = arith.constant 0 : index
      %c0_94 = arith.constant 0 : index
      %316 = vector.load %arg15[%c0_93, %c0_94] : memref<2x128xf32, #tpu.memory_space<vmem>>, vector<2x128xf32>
      tpu.vector_store %arg15[%c0_93, %c0_94], %315 {strides = array<i32>} : memref<2x128xf32, #tpu.memory_space<vmem>>, vector<2x128xf32>,
    } else {
    }
    return
  }
  func.func @transform_0(%arg0: i32, %arg1: i32) -> (i32, i32, i32) {
    %c0_i32 = arith.constant 0 : i32
    %c0_i32_0 = arith.constant 0 : i32
    return %arg1, %arg0, %c0_i32 : i32, i32, i32
  }
  func.func @transform_1(%arg0: i32, %arg1: i32) -> (i32, i32, i32) {
    %c0_i32 = arith.constant 0 : i32
    %c0_i32_0 = arith.constant 0 : i32
    return %arg1, %arg0, %c0_i32 : i32, i32, i32
  }
  func.func @transform_2(%arg0: i32, %arg1: i32) -> (i32, i32, i32) {
    %c0_i32 = arith.constant 0 : i32
    %c0_i32_0 = arith.constant 0 : i32
    return %arg1, %arg0, %c0_i32 : i32, i32, i32
  }
  func.func @transform_3(%arg0: i32, %arg1: i32) -> (i32, i32, i32) {
    %c0_i32 = arith.constant 0 : i32
    %c0_i32_0 = arith.constant 0 : i32
    return %arg1, %arg0, %c0_i32 : i32, i32, i32
  }
  func.func @transform_4(%arg0: i32, %arg1: i32) -> (i32, i32) {
    %c0_i32 = arith.constant 0 : i32
    %c0_i32_0 = arith.constant 0 : i32
    %c0_i32_1 = arith.constant 0 : i32
    return %c0_i32, %c0_i32_0 : i32, i32
  }
  func.func @transform_5(%arg0: i32, %arg1: i32) -> (i32, i32) {
    %c0_i32 = arith.constant 0 : i32
    %c0_i32_0 = arith.constant 0 : i32
    %c0_i32_1 = arith.constant 0 : i32
    return %c0_i32, %c0_i32_0 : i32, i32
  }
  func.func @transform_6(%arg0: i32, %arg1: i32) -> (i32, i32) {
    %c0_i32 = arith.constant 0 : i32
    %c0_i32_0 = arith.constant 0 : i32
    %c0_i32_1 = arith.constant 0 : i32
    return %c0_i32, %c0_i32_0 : i32, i32
  }
  func.func @transform_7(%arg0: i32, %arg1: i32) -> (i32, i32) {
    %c0_i32 = arith.constant 0 : i32
    %c0_i32_0 = arith.constant 0 : i32
    %c0_i32_1 = arith.constant 0 : i32
    return %c0_i32, %c0_i32_0 : i32, i32
  }
  func.func @transform_8(%arg0: i32, %arg1: i32) -> (i32, i32) {
    %c0_i32 = arith.constant 0 : i32
    %c0_i32_0 = arith.constant 0 : i32
    %c0_i32_1 = arith.constant 0 : i32
    return %c0_i32, %c0_i32_0 : i32, i32
  }
  func.func @transform_9(%arg0: i32, %arg1: i32) -> (i32, i32) {
    %c0_i32 = arith.constant 0 : i32
    %c0_i32_0 = arith.constant 0 : i32
    %c0_i32_1 = arith.constant 0 : i32
    return %c0_i32, %c0_i32_0 : i32, i32
  }
  func.func @transform_10(%arg0: i32, %arg1: i32) -> (i32, i32) {
    %c0_i32 = arith.constant 0 : i32
    %c0_i32_0 = arith.constant 0 : i32
    %c0_i32_1 = arith.constant 0 : i32
    return %c0_i32, %c0_i32_0 : i32, i32
  }
  func.func @transform_11(%arg0: i32, %arg1: i32) -> (i32, i32) {
    %c0_i32 = arith.constant 0 : i32
    %c0_i32_0 = arith.constant 0 : i32
    %c0_i32_1 = arith.constant 0 : i32
    return %c0_i32, %c0_i32_0 : i32, i32
  }
  func.func @transform_12(%arg0: i32, %arg1: i32) -> (i32, i32) {
    %c0_i32 = arith.constant 0 : i32
    %c0_i32_0 = arith.constant 0 : i32
    %c0_i32_1 = arith.constant 0 : i32
    return %c0_i32, %c0_i32_0 : i32, i32
  }
  func.func @transform_13(%arg0: i32, %arg1: i32) -> (i32, i32) {
    %c0_i32 = arith.constant 0 : i32
    %c0_i32_0 = arith.constant 0 : i32
    return %arg0, %c0_i32 : i32, i32
  }
}

</mosaic_0001>

<bundles_post_ra>
// kernel: cnn_lstm_forward.1
= control target key start
LH: loop header
LB: loop body
LE: loop exit
PB: predicated region body
PF: predicated region fallthrough
CT: control target
= control target key end

     0   :  { %18 = vsyncpa [#allocation5], 0  ;;  %s1654_s0 = inlined_call_operand.vmem [shape: f32[1,2,8], index: 0, kind: input, shape index: {}]   ;;  %s1655_s1 = inlined_call_operand.vmem [shape: f32[1,2,8], index: 1, kind: input, shape index: {}]   ;;  %s1656_s2 = inlined_call_operand.vmem [shape: f32[1,2,8], index: 2, kind: input, shape index: {}]   ;;  %s1657_s3 = inlined_call_operand.vmem [shape: f32[1,2,8], index: 3, kind: input, shape index: {}]   ;;  %s1658_s4 = inlined_call_operand.hbm [shape: f32[3,16], index: 4, kind: input, shape index: {}]   ;;  %s1659_s5 = inlined_call_operand.hbm [shape: f32[1,16], index: 5, kind: input, shape index: {}]   ;;  %s1660_s6 = inlined_call_operand.vmem [shape: bf16[16,128], index: 6, kind: input, shape index: {}]   ;;  %s1661_s7 = inlined_call_operand.hbm [shape: f32[1,128], index: 7, kind: input, shape index: {}]   ;;  %s1662_s8 = inlined_call_operand.hbm [shape: bf16[32,128], index: 8, kind: input, shape index: {}]   ;;  %s1663_s9 = inlined_call_operand.hbm [shape: bf16[32,64], index: 9, kind: input, shape index: {}]   ;;  %s1664_s10 = inlined_call_operand.hbm [shape: f32[1,64], index: 10, kind: input, shape index: {}]   ;;  %s1665_s11 = inlined_call_operand.vmem [shape: bf16[64,128], index: 11, kind: input, shape index: {}]   ;;  %s1666_s12 = inlined_call_operand.hbm [shape: f32[1,128], index: 12, kind: input, shape index: {}]   ;;  %s1667_s13 = inlined_call_operand.hbm [shape: f32[2,128], index: 13, kind: output, shape index: {}]  }
   0x1   :  { %19 = vsyncpa [#allocation8], 0 }
   0x2   :  { %20 = vsyncpa [#allocation11], 0 }
   0x3   :  { %21 = vsyncpa [#allocation14], 0  ;;  %s47_s27 = sshll.u32 %s1659_s5, 4  ;;  %s48_s27 = int_to_ptr.hbm [resolvable:$true] %s47_s27 }
   0x4   :  { %22 = vsyncpa [#allocation6], 0  ;;  %s1389_s28 = smov [#allocation7]   ;;  %s70_s15 = sshll.u32 %s1662_s8, 4  ;;  %s71_s15 = int_to_ptr.hbm [resolvable:$true] %s70_s15 }
   0x5   :  { %s49_s29 = sshll.u32 %s1389_s28, 4  ;;  %s1390_s16 = smov [#allocation10]   ;;  %s50_s29 = int_to_ptr.vmem [resolvable:$true] %s49_s29 }
   0x6   :  { %52 = dma.hbm_to_vmem [thread:$0]  %s48_s27, 16, %s50_s29, [#allocation8]  }
   0x7   :  { %s72_s17 = sshll.u32 %s1390_s16, 4  ;;  %s1391_s18 = smov 64   ;;  %s73_s17 = int_to_ptr.vmem [resolvable:$true] %s72_s17 }
   0x8   :  { %s1392_s19 = smov 4   ;;  %s97_s21 = sshll.u32 %s1664_s10, 4  ;;  %s98_s21 = int_to_ptr.hbm [resolvable:$true] %s97_s21 }
   0x9   :  { %78 = dma.hbm_to_vmem [thread:$0]  %s71_s15, 256, %s73_s17, [#allocation11], %s1391_s18, %s1391_s18, %s1392_s19  }
   0xa   :  { %s1393_s22 = smov [#allocation13]   ;;  %s36_s25 = sshll.u32 %s1658_s4, 4  ;;  %s37_s25 = int_to_ptr.hbm [resolvable:$true] %s36_s25 }
   0xb   :  { %s99_s23 = sshll.u32 %s1393_s22, 4  ;;  %s1394_s26 = smov [#allocation4]   ;;  %s100_s23 = int_to_ptr.vmem [resolvable:$true] %s99_s23 }
   0xc   :  { %102 = dma.hbm_to_vmem [thread:$0]  %s98_s21, 16, %s100_s23, [#allocation14]  }
   0xd   :  { %s38_s27 = sshll.u32 %s1394_s26, 4  ;;  %s60_s30 = sshll.u32 %s1661_s7, 4  ;;  %s39_s27 = int_to_ptr.vmem [resolvable:$true] %s38_s27  ;;  %s61_s30 = int_to_ptr.hbm [resolvable:$true] %s60_s30 }
   0xe   :  { %41 = dma.hbm_to_vmem [thread:$0]  %s37_s25, 64, %s39_s27, [#allocation5]  }
   0xf   :  { %s83_s15 = sshll.u32 %s1663_s9, 4  ;;  %s1395_s16 = smov [#allocation9]   ;;  %s84_s15 = int_to_ptr.hbm [resolvable:$true] %s83_s15 }
  0x10   :  { %s62_s17 = sshll.u32 %s1395_s16, 4  ;;  %s1396_s4 = smov [#allocation12]   ;;  %s63_s17 = int_to_ptr.vmem [resolvable:$true] %s62_s17 }
  0x11   :  { %65 = dma.hbm_to_vmem [thread:$0]  %s61_s30, 16, %s63_s17, [#allocation8]  }
  0x12   :  { %s85_s5 = sshll.u32 %s1396_s4, 4  ;;  %s110_s22 = sshll.u32 %s1666_s12, 4  ;;  %s86_s5 = int_to_ptr.vmem [resolvable:$true] %s85_s5  ;;  %s111_s22 = int_to_ptr.hbm [resolvable:$true] %s110_s22 }
  0x13   :  { %91 = dma.hbm_to_vmem [thread:$0]  %s84_s15, 256, %s86_s5, [#allocation11], %s1391_s18, %s1391_s18, %s1392_s19  }
  0x14   :  { %s1397_s7 = smov [#allocation15]  }
  0x15   :  { %s112_s23 = sshll.u32 %s1397_s7, 4  ;;  %s113_s23 = int_to_ptr.vmem [resolvable:$true] %s112_s23 }
  0x16   :  { %115 = dma.hbm_to_vmem [thread:$0]  %s111_s22, 16, %s113_s23, [#allocation14]  }
  0x17   :  { %1379 = dma.done.wait [#allocation5], 64  }
  0x18   :  { %1380 = vsyncadd [#allocation5], 4294967232 }
  0x19   :  { %1381 = dma.done.wait [#allocation8], 32  }
  0x1a   :  { %1382 = vsyncadd [#allocation8], 4294967264 }
  0x1b   :  { %1383 = dma.done.wait [#allocation11], 512  }
  0x1c   :  { %1384 = vsyncadd [#allocation11], 4294966784 }
  0x1d   :  { %1385 = dma.done.wait [#allocation14], 32  }
  0x1e   :  { %1386 = vsyncadd [#allocation14], 4294967264  ;;  %v159_v0 = vlaneseq  ;;  %v153_v2 = vld [vmem:[%s1655_s1] sm:$0x3]  ;;  %vm149_vm0 = vcmask 254976   ;;  %v1398_v14 = vmov 0.0  }
  0x1f   :  { %v152_v3 = vld [vmem:[%s1654_s0] sm:$0x3]  ;;  %v175_v4 = vperm.slane %v153_v2, 0  ;;  %v182_v8 = vperm.slane %v153_v2, 1  ;;  %150 = vst.msk [vmem:[#allocation2] sm:$0x3] %vm149_vm0, %v1398_v14 }
  0x20   :  { %v160_v1 = vshrl.u32 %v159_v0, 7  ;;  %v158_v5 = vperm.slane %v152_v3, 0  ;;  %v154_v6 = vld [vmem:[%s1656_s2] sm:$0x3]  ;;  %v165_v9 = vperm.slane %v152_v3, 1  ;;  %v1513_v15 = vld [vmem:[#allocation10 + $0x8] sm:$0xff] }
  0x21   :  { %v194_v7 = vperm.slane %v154_v6, 0  ;;  %v201_v10 = vperm.slane %v154_v6, 1  ;;  %v155_v11 = vld [vmem:[%s1657_s3] sm:$0x3]  ;;  %151 = vst.msk [vmem:[#allocation3] sm:$0x3] %vm149_vm0, %v1398_v14  ;;  %315 = vmatpush.bf16.msra.mxu1 %v1513_v15  ;;  %390 = vmatpush.bf16.msra.mxu2 %v1513_v15 }
  0x22   :  { %1101 = vset.pattern.permute.xlu1 %v160_v1  ;;  %1100 = vset.pattern.permute.xlu0 %v160_v1  ;;  %v233_v12 = vperm.slane %v155_v11, 1  ;;  %v226_v13 = vperm.slane %v155_v11, 0  ;;  %v1078_v16 = vld [vmem:[%s1660_s6] sm:$0xff]  ;;  %v1521_v17 = vld [vmem:[#allocation10] sm:$0xff]  ;;  %vm305_vm1 = vcmask 261120   ;;  %s1399_s3 = smov 32  }
  0x23   :  { %1102 = vset.pattern.permute.xlu2 %v160_v1  ;;  %460 = vmatpush.bf16.msra.mxu3 %v1513_v15  ;;  %v156_v22 = vld [vmem:[#allocation4] sm:$0x7]  ;;  %v1103_v42 = vld [vmem:[#allocation7] ss:$0 sm:$0xff]  ;;  %vm263_vm2 = vcmask 130048   ;;  %vm347_vm5 = vcmask 1041409  }
  0x24   :  { %274 = vmatpush.bf16.msra.mxu0 %v1078_v16  ;;  %v189_v25 = vperm.slane %v156_v22, 1  ;;  %v172_v26 = vperm.slane %v156_v22, 0  ;;  %v208_v27 = vperm.slane %v156_v22, 2  ;;  %s1400_s6 = smov 96   ;;  %vm977_vm7 = vcmask 523264   ;;  %s1401_s16 = smov [#allocation16]  }
  0x25   :  { %316 = vmatpush.bf16.msra.mxu1 %v1521_v17  ;;  %391 = vmatpush.bf16.msra.mxu2 %v1521_v17  ;;  %s1000_s17 = sshll.u32 %s1401_s16, 4  ;;  %s1002_s20 = sshll.u32 %s1667_s13, 4  ;;  %s1001_s17 = int_to_ptr.vmem [resolvable:$true] %s1000_s17  ;;  %s1003_s20 = int_to_ptr.hbm [resolvable:$true] %s1002_s20 }
  0x26   :  { %v290_v18 = vld [vmem:[#allocation2] sm:$0x3] }
  0x27   :  { %v292_v19 = vpack.c.bf16 %v290_v18, %v290_v18  ;;  %461 = vmatpush.bf16.msra.mxu3 %v1521_v17 }
  0x28   :  { %533 = vmatpush.bf16.msrb.mxu0 %v1513_v15  ;;  %v291_v20 = vld [vmem:[#allocation3] sm:$0x3] }
  0x29   :  { %606 = vmatpush.bf16.msrb.mxu1 %v1513_v15  ;;  %679 = vmatpush.bf16.msrb.mxu2 %v1513_v15 }
  0x2a   :  { %180 = vperm.xlu1 %1101, %v175_v4   ;;  %163 = vperm.xlu0 %1100, %v158_v5   ;;  %v1104_v4 = vld [vmem:[#allocation9] ss:$0 sm:$0xff] }
  0x2b   :  { %199 = vperm.xlu2 %1102, %v194_v7   ;;  %1028 = vmatmul.msk.bf16.vlgmr.msra.gmra.mxu1 %vm305_vm1, %v292_v19 }
  0x2c   :  { %752 = vmatpush.bf16.msrb.mxu3 %v1513_v15  ;;  %534 = vmatpush.bf16.msrb.mxu0 %v1521_v17 }
  0x2d   :  { %607 = vmatpush.bf16.msrb.mxu1 %v1521_v17  ;;  %680 = vmatpush.bf16.msrb.mxu2 %v1521_v17 }
  0x30   :  { %753 = vmatpush.bf16.msrb.mxu3 %v1521_v17 }
  0x32   :  { %187 = vperm.xlu1 %1101, %v182_v8   ;;  %170 = vperm.xlu0 %1100, %v165_v9  }
  0x33   :  { %206 = vperm.xlu2 %1102, %v201_v10  }
  0x3a   :  { %238 = vperm.xlu1 %1101, %v233_v12   ;;  %231 = vperm.xlu0 %1100, %v226_v13  }
  0x42   :  { %357 = vrot.lane.b32.xlu0 %v291_v20, %s1399_s3 }
  0x85   :  { %v200_v21 = vpop.permute.xlu2 %199 }
  0x86   :  { %v209_v35 = vmul.f32 %v208_v27, %v200_v21  ;;  %v222_v38 = vmul.f32 %v200_v21, %v189_v25 }
  0x8d   :  { %v207_v34 = vpop.permute.xlu2 %206 }
  0x8e   :  { %v210_v40 = vmul.f32 %v208_v27, %v207_v34  ;;  %v223_v44 = vmul.f32 %v207_v34, %v189_v25 }
  0x9c   :  { %v181_v23 = vpop.permute.xlu1 %180  ;;  %v164_v24 = vpop.permute.xlu0 %163 }
  0x9d   :  { %v190_v28 = vmul.f32 %v189_v25, %v181_v23  ;;  %v173_v29 = vmul.f32 %v172_v26, %v164_v24  ;;  %v220_v39 = vmul.f32 %v181_v23, %v172_v26  ;;  %v286_v23 = vand.u32 127, %v159_v0 }
  0x9f   :  { %v192_v36 = vadd.f32 %v190_v28, %v173_v29  ;;  %v224_v48 = vadd.f32 %v222_v38, %v220_v39  ;;  %vm287_vm3 = vcmp.ge.s32.totalorder %v286_v23, 64  ;;  %vm288_vm4 = vcmp.lt.s32.totalorder %v286_v23, 96 }
  0xa0   :  { %vm1546_vm6 = vmand %vm287_vm3, %vm288_vm4 }
  0xa1   :  { %v211_v43 = vadd.f32 %v209_v35, %v192_v36 }
  0xa3   :  { %v216_v52 = vadd.f32 %v1103_v42, %v211_v43 }
  0xa4   :  { %v188_v30 = vpop.permute.xlu1 %187  ;;  %v171_v31 = vpop.permute.xlu0 %170 }
  0xa5   :  { %v191_v32 = vmul.f32 %v189_v25, %v188_v30  ;;  %v174_v33 = vmul.f32 %v172_v26, %v171_v31  ;;  %v221_v41 = vmul.f32 %v188_v30, %v172_v26  ;;  %v218_v58 = vmax.f32 %v216_v52, 0.0 }
  0xa7   :  { %v193_v37 = vadd.f32 %v191_v32, %v174_v33  ;;  %v225_v49 = vadd.f32 %v223_v44, %v221_v41 }
  0xa8   :  { %v318_v2 = vpop.f32.mrf.mxu1 }
  0xa9   :  { %v212_v45 = vadd.f32 %v210_v40, %v193_v37  ;;  %v323_v9 = vrot.slane %v318_v2, 1 }
  0xab   :  { %v217_v53 = vadd.f32 %v1103_v42, %v212_v45 }
  0xac   :  { %v239_v46 = vpop.permute.xlu1 %238  ;;  %v232_v47 = vpop.permute.xlu0 %231 }
  0xad   :  { %v241_v50 = vmul.f32 %v239_v46, %v208_v27  ;;  %v240_v51 = vmul.f32 %v232_v47, %v208_v27  ;;  %v219_v59 = vmax.f32 %v217_v53, 0.0 }
  0xaf   :  { %v243_v54 = vadd.f32 %v241_v50, %v225_v49  ;;  %v242_v55 = vadd.f32 %v240_v51, %v224_v48 }
  0xb0   :  { %v320_v3 = vpop.f32.mrf.mxu1 }
  0xb1   :  { %v245_v56 = vadd.f32 %v1103_v42, %v243_v54  ;;  %v244_v57 = vadd.f32 %v1103_v42, %v242_v55 }
  0xb3   :  { %v247_v60 = vmax.f32 %v245_v56, 0.0  ;;  %v246_v61 = vmax.f32 %v244_v57, 0.0 }
  0xb4   :  { %v358_v36 = vpop.permute.xlu0 %357 }
  0xb5   :  { %v248_v62 = vmax.f32 %v218_v58, %v246_v61  ;;  %v249_v63 = vmax.f32 %v219_v59, %v247_v60 }
  0xb7   :  { %v250_v1 = vpack.c.bf16 %v249_v63, %v248_v62 }
  0xb9   :  { %1019 = vmatmul.msk.bf16.vlgmr.msra.gmra.mxu0 %vm263_vm2, %v250_v1 }
  0xba   :  { %825 = vmatpush.bf16.msra.mxu0 %v1513_v15 }
  0xbe   :  { %826 = vmatpush.bf16.msra.mxu0 %v1521_v17 }
 0x136   :  { %v276_v5 = vpop.f32.mrf.mxu0 }
 0x137   :  { %v1539_v6 = vadd.f32 %v1104_v4, %v276_v5 }
 0x139   :  { %v326_v7 = vadd.f32 %v318_v2, %v1539_v6 }
 0x13b   :  { %v328_v8 = vmax.f32 %v326_v7, -60.0 }
 0x13d   :  { %v330_v10 = vsub.f32 0.0, %v328_v8 }
 0x13e   :  { %v278_v11 = vpop.f32.mrf.mxu0 }
 0x13f   :  { %v332_v12 = vmul.f32 1.442695, %v330_v10  ;;  %v1542_v13 = vadd.f32 %v1104_v4, %v278_v11 }
 0x141   :  { %v327_v14 = vadd.f32 %v323_v9, %v1542_v13  ;;  %1107 = vpow2.f32 %v332_v12 }
 0x143   :  { %v329_v15 = vmax.f32 %v327_v14, -60.0 }
 0x145   :  { %v331_v16 = vsub.f32 0.0, %v329_v15 }
 0x147   :  { %v334_v17 = vmul.f32 1.442695, %v331_v16  ;;  %v1108_v18 = vpop.eup %1107 }
 0x148   :  { %v336_v19 = vadd.f32 1.0, %v1108_v18 }
 0x149   :  { %1109 = vpow2.f32 %v334_v17 }
 0x14a   :  { %1111 = vrcp.f32 %v336_v19 }
 0x14f   :  { %v1110_v20 = vpop.eup %1109 }
 0x150   :  { %v337_v21 = vadd.f32 1.0, %v1110_v20  ;;  %v1112_v22 = vpop.eup %1111 }
 0x151   :  { %v340_v25 = vmul.f32 2.0, %v1112_v22 }
 0x152   :  { %1113 = vrcp.f32 %v337_v21 }
 0x153   :  { %v1029_v30 = vadd.f32 -1.0, %v340_v25 }
 0x158   :  { %v1114_v24 = vpop.eup %1113 }
 0x159   :  { %v341_v26 = vmul.f32 2.0, %v1114_v24  ;;  %v352_v28 = vrot.slane %v1114_v24, 7 }
 0x15b   :  { %v1030_v27 = vadd.f32 -1.0, %v341_v26  ;;  %v353_v33 = vsel %vm347_vm5, %v352_v28, %v1112_v22 }
 0x15d   :  { %v346_v31 = vrot.slane %v1030_v27, 7 }
 0x15f   :  { %v348_v32 = vsel %vm347_vm5, %v346_v31, %v1029_v30 }
 0x160   :  { %v355_v0 = vsel %vm1546_vm6, %v348_v32, %v353_v33 }
 0x161   :  { %362 = vrot.lane.b32.xlu2 %v355_v0, %s1391_s18  ;;  %v360_v37 = vmul.f32 %v358_v36, %v355_v0 }
 0x1bb   :  { %v363_v34 = vpop.permute.xlu2 %362 }
 0x1bc   :  { %v365_v35 = vmul.f32 %v363_v34, %v355_v0 }
 0x1be   :  { %367 = vrot.lane.b32.xlu1 %v365_v35, %s1399_s3 }
 0x230   :  { %v368_v38 = vpop.permute.xlu1 %367 }
 0x231   :  { %v370_v39 = vadd.f32 %v368_v38, %v360_v37 }
 0x233   :  { %1115 = vtanh.f32 %v370_v39 }
 0x239   :  { %v1116_v40 = vpop.eup %1115 }
 0x23a   :  { %373 = vrot.lane.b32.xlu2 %v1116_v40, %s1391_s18 }
 0x294   :  { %v374_v41 = vpop.permute.xlu2 %373 }
 0x295   :  { %v376_v42 = vmul.f32 %v374_v41, %v355_v0 }
 0x297   :  { %v377_v43 = vpack.c.bf16 %v376_v42, %v376_v42 }
 0x299   :  { %379 = vrot.lane.b32.xlu0 %v377_v43, %s1399_s3 }
 0x30b   :  { %v380_v44 = vpop.permute.xlu0 %379 }
 0x30c   :  { %1031 = vmatmul.msk.bf16.vlgmr.msra.gmra.mxu2 %vm305_vm1, %v380_v44 }
 0x38f   :  { %v393_v45 = vpop.f32.mrf.mxu2 }
 0x390   :  { %v398_v46 = vrot.slane %v393_v45, 7  ;;  %v402_v47 = vadd.f32 %v393_v45, %v1542_v13 }
 0x392   :  { %v401_v48 = vadd.f32 %v398_v46, %v1539_v6  ;;  %v404_v49 = vmax.f32 %v402_v47, -60.0 }
 0x394   :  { %v403_v50 = vmax.f32 %v401_v48, -60.0  ;;  %v406_v51 = vsub.f32 0.0, %v404_v49 }
 0x396   :  { %v405_v52 = vsub.f32 0.0, %v403_v50  ;;  %v409_v53 = vmul.f32 1.442695, %v406_v51 }
 0x397   :  { %v395_v54 = vpop.f32.mrf.mxu2 }
 0x398   :  { %v407_v55 = vmul.f32 1.442695, %v405_v52  ;;  %1117 = vpow2.f32 %v409_v53 }
 0x39a   :  { %1119 = vpow2.f32 %v407_v55 }
 0x39e   :  { %v1118_v56 = vpop.eup %1117 }
 0x39f   :  { %v412_v57 = vadd.f32 1.0, %v1118_v56 }
 0x3a0   :  { %v1120_v58 = vpop.eup %1119 }
 0x3a1   :  { %v411_v59 = vadd.f32 1.0, %v1120_v58  ;;  %1121 = vrcp.f32 %v412_v57 }
 0x3a3   :  { %1123 = vrcp.f32 %v411_v59 }
 0x3a7   :  { %v1122_v60 = vpop.eup %1121 }
 0x3a8   :  { %v416_v63 = vmul.f32 2.0, %v1122_v60 }
 0x3a9   :  { %v1124_v61 = vpop.eup %1123 }
 0x3aa   :  { %v415_v62 = vmul.f32 2.0, %v1124_v61  ;;  %v426_v2 = vrot.slane %v1124_v61, 1  ;;  %v1033_v3 = vadd.f32 -1.0, %v416_v63 }
 0x3ac   :  { %v1032_v1 = vadd.f32 -1.0, %v415_v62  ;;  %v427_v7 = vsel %vm347_vm5, %v1122_v60, %v426_v2 }
 0x3ae   :  { %v421_v4 = vrot.slane %v1032_v1, 1 }
 0x3b0   :  { %v422_v5 = vsel %vm347_vm5, %v1033_v3, %v421_v4 }
 0x3b1   :  { %v429_v8 = vsel %vm1546_vm6, %v422_v5, %v427_v7 }
 0x3b2   :  { %432 = vrot.lane.b32.xlu1 %v429_v8, %s1391_s18  ;;  %v430_v11 = vmul.f32 %v429_v8, %v370_v39 }
 0x424   :  { %v433_v9 = vpop.permute.xlu1 %432 }
 0x425   :  { %v435_v10 = vmul.f32 %v433_v9, %v429_v8 }
 0x427   :  { %437 = vrot.lane.b32.xlu2 %v435_v10, %s1399_s3 }
 0x481   :  { %v438_v12 = vpop.permute.xlu2 %437 }
 0x482   :  { %v440_v14 = vadd.f32 %v438_v12, %v430_v11 }
 0x484   :  { %1125 = vtanh.f32 %v440_v14 }
 0x48a   :  { %v1126_v15 = vpop.eup %1125 }
 0x48b   :  { %443 = vrot.lane.b32.xlu0 %v1126_v15, %s1391_s18 }
 0x4fd   :  { %v444_v16 = vpop.permute.xlu0 %443 }
 0x4fe   :  { %v446_v17 = vmul.f32 %v444_v16, %v429_v8 }
 0x500   :  { %v447_v18 = vpack.c.bf16 %v446_v17, %v446_v17 }
 0x502   :  { %449 = vrot.lane.b32.xlu1 %v447_v18, %s1399_s3 }
 0x574   :  { %v450_v19 = vpop.permute.xlu1 %449 }
 0x575   :  { %1034 = vmatmul.msk.bf16.vlgmr.msra.gmra.mxu3 %vm305_vm1, %v450_v19 }
 0x5f8   :  { %v463_v20 = vpop.f32.mrf.mxu3 }
 0x5f9   :  { %v468_v21 = vrot.slane %v463_v20, 6  ;;  %v469_v22 = vrot.slane %v463_v20, 7 }
 0x5fb   :  { %v472_v23 = vadd.f32 %v468_v21, %v1539_v6  ;;  %v473_v24 = vadd.f32 %v469_v22, %v1542_v13 }
 0x5fd   :  { %v474_v25 = vmax.f32 %v472_v23, -60.0  ;;  %v475_v26 = vmax.f32 %v473_v24, -60.0 }
 0x5ff   :  { %v476_v27 = vsub.f32 0.0, %v474_v25  ;;  %v477_v28 = vsub.f32 0.0, %v475_v26 }
 0x600   :  { %v465_v30 = vpop.f32.mrf.mxu3 }
 0x601   :  { %v478_v31 = vmul.f32 1.442695, %v476_v27  ;;  %v480_v32 = vmul.f32 1.442695, %v477_v28 }
 0x603   :  { %1127 = vpow2.f32 %v478_v31 }
 0x604   :  { %1129 = vpow2.f32 %v480_v32 }
 0x609   :  { %v1128_v33 = vpop.eup %1127 }
 0x60a   :  { %v1130_v0 = vpop.eup %1129  ;;  %v482_v34 = vadd.f32 1.0, %v1128_v33 }
 0x60b   :  { %v483_v35 = vadd.f32 1.0, %v1130_v0 }
 0x60c   :  { %1131 = vrcp.f32 %v482_v34 }
 0x60d   :  { %1133 = vrcp.f32 %v483_v35 }
 0x612   :  { %v1132_v36 = vpop.eup %1131 }
 0x613   :  { %v1134_v37 = vpop.eup %1133  ;;  %v486_v38 = vmul.f32 2.0, %v1132_v36  ;;  %v498_v42 = vrot.slane %v1132_v36, 2 }
 0x614   :  { %v487_v39 = vmul.f32 2.0, %v1134_v37  ;;  %v499_v43 = vrot.slane %v1134_v37, 1 }
 0x615   :  { %v1035_v40 = vadd.f32 -1.0, %v486_v38 }
 0x616   :  { %v1036_v41 = vadd.f32 -1.0, %v487_v39  ;;  %v500_v47 = vsel %vm347_vm5, %v499_v43, %v498_v42 }
 0x617   :  { %v492_v44 = vrot.slane %v1035_v40, 2 }
 0x618   :  { %v493_v45 = vrot.slane %v1036_v41, 1 }
 0x61a   :  { %v494_v46 = vsel %vm347_vm5, %v493_v45, %v492_v44 }
 0x61b   :  { %v502_v48 = vsel %vm1546_vm6, %v494_v46, %v500_v47 }
 0x61c   :  { %505 = vrot.lane.b32.xlu2 %v502_v48, %s1391_s18  ;;  %v503_v51 = vmul.f32 %v502_v48, %v440_v14 }
 0x676   :  { %v506_v49 = vpop.permute.xlu2 %505 }
 0x677   :  { %v508_v50 = vmul.f32 %v506_v49, %v502_v48 }
 0x679   :  { %510 = vrot.lane.b32.xlu0 %v508_v50, %s1399_s3 }
 0x6eb   :  { %v511_v52 = vpop.permute.xlu0 %510 }
 0x6ec   :  { %v513_v53 = vadd.f32 %v511_v52, %v503_v51 }
 0x6ee   :  { %1135 = vtanh.f32 %v513_v53 }
 0x6f4   :  { %v1136_v54 = vpop.eup %1135 }
 0x6f5   :  { %516 = vrot.lane.b32.xlu1 %v1136_v54, %s1391_s18 }
 0x767   :  { %v517_v55 = vpop.permute.xlu1 %516 }
 0x768   :  { %v519_v56 = vmul.f32 %v517_v55, %v502_v48 }
 0x76a   :  { %v520_v57 = vpack.c.bf16 %v519_v56, %v519_v56 }
 0x76c   :  { %522 = vrot.lane.b32.xlu2 %v520_v57, %s1399_s3 }
 0x7c6   :  { %v523_v58 = vpop.permute.xlu2 %522 }
 0x7c7   :  { %1037 = vmatmul.msk.bf16.vlgmr.msrb.gmra.mxu0 %vm305_vm1, %v523_v58 }
 0x844   :  { %v536_v59 = vpop.f32.mrf.mxu0 }
 0x845   :  { %v541_v60 = vrot.slane %v536_v59, 5  ;;  %v542_v61 = vrot.slane %v536_v59, 6 }
 0x847   :  { %v545_v62 = vadd.f32 %v541_v60, %v1539_v6  ;;  %v546_v63 = vadd.f32 %v542_v61, %v1542_v13 }
 0x849   :  { %v547_v1 = vmax.f32 %v545_v62, -60.0  ;;  %v548_v2 = vmax.f32 %v546_v63, -60.0 }
 0x84b   :  { %v549_v3 = vsub.f32 0.0, %v547_v1  ;;  %v550_v4 = vsub.f32 0.0, %v548_v2 }
 0x84c   :  { %v538_v5 = vpop.f32.mrf.mxu0 }
 0x84d   :  { %v551_v7 = vmul.f32 1.442695, %v549_v3  ;;  %v553_v8 = vmul.f32 1.442695, %v550_v4 }
 0x84f   :  { %1137 = vpow2.f32 %v551_v7 }
 0x850   :  { %1139 = vpow2.f32 %v553_v8 }
 0x855   :  { %v1138_v9 = vpop.eup %1137 }
 0x856   :  { %v1140_v10 = vpop.eup %1139  ;;  %v555_v11 = vadd.f32 1.0, %v1138_v9 }
 0x857   :  { %v556_v12 = vadd.f32 1.0, %v1140_v10 }
 0x858   :  { %1141 = vrcp.f32 %v555_v11 }
 0x859   :  { %1143 = vrcp.f32 %v556_v12 }
 0x85e   :  { %v1142_v14 = vpop.eup %1141 }
 0x85f   :  { %v1144_v15 = vpop.eup %1143  ;;  %v559_v16 = vmul.f32 2.0, %v1142_v14  ;;  %v571_v20 = vrot.slane %v1142_v14, 3 }
 0x860   :  { %v560_v17 = vmul.f32 2.0, %v1144_v15  ;;  %v572_v21 = vrot.slane %v1144_v15, 2 }
 0x861   :  { %v1038_v18 = vadd.f32 -1.0, %v559_v16 }
 0x862   :  { %v1039_v19 = vadd.f32 -1.0, %v560_v17  ;;  %v573_v25 = vsel %vm347_vm5, %v572_v21, %v571_v20 }
 0x863   :  { %v565_v22 = vrot.slane %v1038_v18, 3 }
 0x864   :  { %v566_v23 = vrot.slane %v1039_v19, 2 }
 0x866   :  { %v567_v24 = vsel %vm347_vm5, %v566_v23, %v565_v22 }
 0x867   :  { %v575_v26 = vsel %vm1546_vm6, %v567_v24, %v573_v25 }
 0x868   :  { %578 = vrot.lane.b32.xlu0 %v575_v26, %s1391_s18  ;;  %v576_v30 = vmul.f32 %v575_v26, %v513_v53 }
 0x8da   :  { %v579_v27 = vpop.permute.xlu0 %578 }
 0x8db   :  { %v581_v28 = vmul.f32 %v579_v27, %v575_v26 }
 0x8dd   :  { %583 = vrot.lane.b32.xlu1 %v581_v28, %s1399_s3 }
 0x94f   :  { %v584_v31 = vpop.permute.xlu1 %583 }
 0x950   :  { %v586_v32 = vadd.f32 %v584_v31, %v576_v30 }
 0x952   :  { %1145 = vtanh.f32 %v586_v32 }
 0x958   :  { %v1146_v33 = vpop.eup %1145 }
 0x959   :  { %589 = vrot.lane.b32.xlu2 %v1146_v33, %s1391_s18 }
 0x9b3   :  { %v590_v0 = vpop.permute.xlu2 %589 }
 0x9b4   :  { %v592_v34 = vmul.f32 %v590_v0, %v575_v26 }
 0x9b6   :  { %v593_v35 = vpack.c.bf16 %v592_v34, %v592_v34 }
 0x9b8   :  { %595 = vrot.lane.b32.xlu0 %v593_v35, %s1399_s3 }
 0xa2a   :  { %v596_v36 = vpop.permute.xlu0 %595 }
 0xa2b   :  { %1040 = vmatmul.msk.bf16.vlgmr.msrb.gmra.mxu1 %vm305_vm1, %v596_v36 }
 0xaa8   :  { %v609_v37 = vpop.f32.mrf.mxu1 }
 0xaa9   :  { %v614_v38 = vrot.slane %v609_v37, 4  ;;  %v615_v39 = vrot.slane %v609_v37, 5 }
 0xaab   :  { %v618_v40 = vadd.f32 %v614_v38, %v1539_v6  ;;  %v619_v41 = vadd.f32 %v615_v39, %v1542_v13 }
 0xaad   :  { %v620_v42 = vmax.f32 %v618_v40, -60.0  ;;  %v621_v43 = vmax.f32 %v619_v41, -60.0 }
 0xaaf   :  { %v622_v44 = vsub.f32 0.0, %v620_v42  ;;  %v623_v45 = vsub.f32 0.0, %v621_v43 }
 0xab0   :  { %v611_v46 = vpop.f32.mrf.mxu1 }
 0xab1   :  { %v624_v47 = vmul.f32 1.442695, %v622_v44  ;;  %v626_v48 = vmul.f32 1.442695, %v623_v45 }
 0xab3   :  { %1147 = vpow2.f32 %v624_v47 }
 0xab4   :  { %1149 = vpow2.f32 %v626_v48 }
 0xab9   :  { %v1148_v49 = vpop.eup %1147 }
 0xaba   :  { %v1150_v50 = vpop.eup %1149  ;;  %v628_v51 = vadd.f32 1.0, %v1148_v49 }
 0xabb   :  { %v629_v52 = vadd.f32 1.0, %v1150_v50 }
 0xabc   :  { %1151 = vrcp.f32 %v628_v51 }
 0xabd   :  { %1153 = vrcp.f32 %v629_v52 }
 0xac2   :  { %v1152_v53 = vpop.eup %1151 }
 0xac3   :  { %v1154_v54 = vpop.eup %1153  ;;  %v632_v55 = vmul.f32 2.0, %v1152_v53  ;;  %v644_v59 = vrot.slane %v1152_v53, 4 }
 0xac4   :  { %v633_v56 = vmul.f32 2.0, %v1154_v54  ;;  %v645_v60 = vrot.slane %v1154_v54, 3 }
 0xac5   :  { %v1041_v57 = vadd.f32 -1.0, %v632_v55 }
 0xac6   :  { %v1042_v58 = vadd.f32 -1.0, %v633_v56  ;;  %v646_v1 = vsel %vm347_vm5, %v645_v60, %v644_v59 }
 0xac7   :  { %v638_v61 = vrot.slane %v1041_v57, 4 }
 0xac8   :  { %v639_v62 = vrot.slane %v1042_v58, 3 }
 0xaca   :  { %v640_v63 = vsel %vm347_vm5, %v639_v62, %v638_v61 }
 0xacb   :  { %v648_v2 = vsel %vm1546_vm6, %v640_v63, %v646_v1 }
 0xacc   :  { %651 = vrot.lane.b32.xlu1 %v648_v2, %s1391_s18  ;;  %v649_v5 = vmul.f32 %v648_v2, %v586_v32 }
 0xb3e   :  { %v652_v3 = vpop.permute.xlu1 %651 }
 0xb3f   :  { %v654_v4 = vmul.f32 %v652_v3, %v648_v2 }
 0xb41   :  { %656 = vrot.lane.b32.xlu2 %v654_v4, %s1399_s3 }
 0xb9b   :  { %v657_v7 = vpop.permute.xlu2 %656 }
 0xb9c   :  { %v659_v8 = vadd.f32 %v657_v7, %v649_v5 }
 0xb9e   :  { %1155 = vtanh.f32 %v659_v8 }
 0xba4   :  { %v1156_v9 = vpop.eup %1155 }
 0xba5   :  { %662 = vrot.lane.b32.xlu0 %v1156_v9, %s1391_s18 }
 0xc17   :  { %v663_v10 = vpop.permute.xlu0 %662 }
 0xc18   :  { %v665_v11 = vmul.f32 %v663_v10, %v648_v2 }
 0xc1a   :  { %v666_v12 = vpack.c.bf16 %v665_v11, %v665_v11 }
 0xc1c   :  { %668 = vrot.lane.b32.xlu1 %v666_v12, %s1399_s3 }
 0xc8e   :  { %v669_v14 = vpop.permute.xlu1 %668 }
 0xc8f   :  { %1043 = vmatmul.msk.bf16.vlgmr.msrb.gmra.mxu2 %vm305_vm1, %v669_v14 }
 0xd12   :  { %v682_v15 = vpop.f32.mrf.mxu2 }
 0xd13   :  { %v687_v16 = vrot.slane %v682_v15, 3  ;;  %v688_v17 = vrot.slane %v682_v15, 4 }
 0xd15   :  { %v691_v18 = vadd.f32 %v687_v16, %v1539_v6  ;;  %v692_v19 = vadd.f32 %v688_v17, %v1542_v13 }
 0xd17   :  { %v693_v20 = vmax.f32 %v691_v18, -60.0  ;;  %v694_v21 = vmax.f32 %v692_v19, -60.0 }
 0xd19   :  { %v695_v22 = vsub.f32 0.0, %v693_v20  ;;  %v696_v23 = vsub.f32 0.0, %v694_v21 }
 0xd1a   :  { %v684_v24 = vpop.f32.mrf.mxu2 }
 0xd1b   :  { %v697_v25 = vmul.f32 1.442695, %v695_v22  ;;  %v699_v26 = vmul.f32 1.442695, %v696_v23 }
 0xd1d   :  { %1157 = vpow2.f32 %v697_v25 }
 0xd1e   :  { %1159 = vpow2.f32 %v699_v26 }
 0xd23   :  { %v1158_v27 = vpop.eup %1157 }
 0xd24   :  { %v1160_v28 = vpop.eup %1159  ;;  %v701_v30 = vadd.f32 1.0, %v1158_v27 }
 0xd25   :  { %v702_v31 = vadd.f32 1.0, %v1160_v28 }
 0xd26   :  { %1161 = vrcp.f32 %v701_v30 }
 0xd27   :  { %1163 = vrcp.f32 %v702_v31 }
 0xd2c   :  { %v1162_v32 = vpop.eup %1161 }
 0xd2d   :  { %v1164_v33 = vpop.eup %1163  ;;  %v705_v0 = vmul.f32 2.0, %v1162_v32  ;;  %v717_v37 = vrot.slane %v1162_v32, 5 }
 0xd2e   :  { %v706_v34 = vmul.f32 2.0, %v1164_v33  ;;  %v718_v38 = vrot.slane %v1164_v33, 4 }
 0xd2f   :  { %v1044_v35 = vadd.f32 -1.0, %v705_v0 }
 0xd30   :  { %v1045_v36 = vadd.f32 -1.0, %v706_v34  ;;  %v719_v42 = vsel %vm347_vm5, %v718_v38, %v717_v37 }
 0xd31   :  { %v711_v39 = vrot.slane %v1044_v35, 5 }
 0xd32   :  { %v712_v40 = vrot.slane %v1045_v36, 4 }
 0xd34   :  { %v713_v41 = vsel %vm347_vm5, %v712_v40, %v711_v39 }
 0xd35   :  { %v721_v43 = vsel %vm1546_vm6, %v713_v41, %v719_v42 }
 0xd36   :  { %724 = vrot.lane.b32.xlu2 %v721_v43, %s1391_s18  ;;  %v722_v46 = vmul.f32 %v721_v43, %v659_v8 }
 0xd90   :  { %v725_v44 = vpop.permute.xlu2 %724 }
 0xd91   :  { %v727_v45 = vmul.f32 %v725_v44, %v721_v43 }
 0xd93   :  { %729 = vrot.lane.b32.xlu0 %v727_v45, %s1399_s3 }
 0xe05   :  { %v730_v47 = vpop.permute.xlu0 %729 }
 0xe06   :  { %v732_v48 = vadd.f32 %v730_v47, %v722_v46 }
 0xe08   :  { %1165 = vtanh.f32 %v732_v48 }
 0xe0e   :  { %v1166_v49 = vpop.eup %1165 }
 0xe0f   :  { %735 = vrot.lane.b32.xlu1 %v1166_v49, %s1391_s18 }
 0xe81   :  { %v736_v50 = vpop.permute.xlu1 %735 }
 0xe82   :  { %v738_v51 = vmul.f32 %v736_v50, %v721_v43 }
 0xe84   :  { %v739_v52 = vpack.c.bf16 %v738_v51, %v738_v51 }
 0xe86   :  { %741 = vrot.lane.b32.xlu2 %v739_v52, %s1399_s3 }
 0xee0   :  { %v742_v53 = vpop.permute.xlu2 %741 }
 0xee1   :  { %1046 = vmatmul.msk.bf16.vlgmr.msrb.gmra.mxu3 %vm305_vm1, %v742_v53 }
 0xf64   :  { %v755_v54 = vpop.f32.mrf.mxu3 }
 0xf65   :  { %v760_v55 = vrot.slane %v755_v54, 2  ;;  %v761_v56 = vrot.slane %v755_v54, 3 }
 0xf67   :  { %v764_v57 = vadd.f32 %v760_v55, %v1539_v6  ;;  %v765_v58 = vadd.f32 %v761_v56, %v1542_v13 }
 0xf69   :  { %v766_v59 = vmax.f32 %v764_v57, -60.0  ;;  %v767_v60 = vmax.f32 %v765_v58, -60.0 }
 0xf6b   :  { %v768_v61 = vsub.f32 0.0, %v766_v59  ;;  %v769_v62 = vsub.f32 0.0, %v767_v60 }
 0xf6c   :  { %v757_v63 = vpop.f32.mrf.mxu3 }
 0xf6d   :  { %v770_v1 = vmul.f32 1.442695, %v768_v61  ;;  %v772_v2 = vmul.f32 1.442695, %v769_v62 }
 0xf6f   :  { %1167 = vpow2.f32 %v770_v1 }
 0xf70   :  { %1169 = vpow2.f32 %v772_v2 }
 0xf75   :  { %v1168_v3 = vpop.eup %1167 }
 0xf76   :  { %v1170_v4 = vpop.eup %1169  ;;  %v774_v5 = vadd.f32 1.0, %v1168_v3 }
 0xf77   :  { %v775_v7 = vadd.f32 1.0, %v1170_v4 }
 0xf78   :  { %1171 = vrcp.f32 %v774_v5  ;;  %v1082_v5 = vld [vmem:[#allocation12 + $0x8] sm:$0xff] }
 0xf79   :  { %1173 = vrcp.f32 %v775_v7  ;;  %932 = vmatpush.bf16.msra.mxu1 %v1082_v5  ;;  %v1081_v7 = vld [vmem:[#allocation12] sm:$0xff] }
 0xf7d   :  { %933 = vmatpush.bf16.msra.mxu1 %v1081_v7 }
 0xf7e   :  { %v1172_v8 = vpop.eup %1171 }
 0xf7f   :  { %v1174_v9 = vpop.eup %1173  ;;  %v778_v10 = vmul.f32 2.0, %v1172_v8  ;;  %v790_v15 = vrot.slane %v1172_v8, 6  ;;  %v1086_v8 = vld [vmem:[%s1665_s11 + $0x18] sm:$0xff] }
 0xf80   :  { %v779_v11 = vmul.f32 2.0, %v1174_v9  ;;  %v791_v16 = vrot.slane %v1174_v9, 5  ;;  %985 = vmatpush.bf16.msra.mxu2 %v1086_v8  ;;  %v1085_v9 = vld [vmem:[%s1665_s11 + $0x10] sm:$0xff] }
 0xf81   :  { %v1047_v12 = vadd.f32 -1.0, %v778_v10 }
 0xf82   :  { %v1048_v14 = vadd.f32 -1.0, %v779_v11  ;;  %v792_v20 = vsel %vm347_vm5, %v791_v16, %v790_v15  ;;  %v1084_v11 = vld [vmem:[%s1665_s11 + $0x8] sm:$0xff] }
 0xf83   :  { %v784_v17 = vrot.slane %v1047_v12, 6  ;;  %v1105_v15 = vld [vmem:[#allocation13] ss:$0 sm:$0xff] }
 0xf84   :  { %v785_v18 = vrot.slane %v1048_v14, 5  ;;  %986 = vmatpush.bf16.msra.mxu2 %v1085_v9  ;;  %v1083_v14 = vld [vmem:[%s1665_s11] sm:$0xff] }
 0xf86   :  { %v786_v19 = vsel %vm347_vm5, %v785_v18, %v784_v17 }
 0xf87   :  { %v794_v21 = vsel %vm1546_vm6, %v786_v19, %v792_v20 }
 0xf88   :  { %797 = vrot.lane.b32.xlu0 %v794_v21, %s1391_s18  ;;  %v795_v24 = vmul.f32 %v794_v21, %v732_v48  ;;  %987 = vmatpush.bf16.msra.mxu2 %v1084_v11 }
 0xf8c   :  { %988 = vmatpush.bf16.msra.mxu2 %v1083_v14 }
 0xffa   :  { %v798_v22 = vpop.permute.xlu0 %797 }
 0xffb   :  { %v800_v23 = vmul.f32 %v798_v22, %v794_v21 }
 0xffd   :  { %802 = vrot.lane.b32.xlu1 %v800_v23, %s1399_s3 }
0x106f   :  { %v803_v25 = vpop.permute.xlu1 %802 }
0x1070   :  { %v805_v26 = vadd.f32 %v803_v25, %v795_v24 }
0x1072   :  { %1175 = vtanh.f32 %v805_v26 }
0x1078   :  { %v1176_v27 = vpop.eup %1175 }
0x1079   :  { %808 = vrot.lane.b32.xlu2 %v1176_v27, %s1391_s18 }
0x10d3   :  { %v809_v28 = vpop.permute.xlu2 %808 }
0x10d4   :  { %v811_v30 = vmul.f32 %v809_v28, %v794_v21  ;;  %v1106_v21 = vld [vmem:[#allocation15] ss:$0 sm:$0xff] }
0x10d6   :  { %v812_v31 = vpack.c.bf16 %v811_v30, %v811_v30 }
0x10d8   :  { %814 = vrot.lane.b32.xlu0 %v812_v31, %s1399_s3 }
0x114a   :  { %v815_v32 = vpop.permute.xlu0 %814 }
0x114b   :  { %1049 = vmatmul.msk.bf16.vlgmr.msra.gmra.mxu0 %vm305_vm1, %v815_v32 }
0x11c8   :  { %v828_v33 = vpop.f32.mrf.mxu0 }
0x11c9   :  { %v833_v0 = vrot.slane %v828_v33, 1  ;;  %v834_v34 = vrot.slane %v828_v33, 2 }
0x11cb   :  { %v837_v35 = vadd.f32 %v833_v0, %v1539_v6  ;;  %v838_v36 = vadd.f32 %v834_v34, %v1542_v13 }
0x11cd   :  { %v839_v37 = vmax.f32 %v837_v35, -60.0  ;;  %v840_v38 = vmax.f32 %v838_v36, -60.0 }
0x11cf   :  { %v841_v39 = vsub.f32 0.0, %v839_v37  ;;  %v842_v40 = vsub.f32 0.0, %v840_v38 }
0x11d0   :  { %v830_v41 = vpop.f32.mrf.mxu0 }
0x11d1   :  { %v843_v42 = vmul.f32 1.442695, %v841_v39  ;;  %v845_v43 = vmul.f32 1.442695, %v842_v40 }
0x11d3   :  { %1177 = vpow2.f32 %v843_v42 }
0x11d4   :  { %1179 = vpow2.f32 %v845_v43 }
0x11d9   :  { %v1178_v44 = vpop.eup %1177 }
0x11da   :  { %v1180_v45 = vpop.eup %1179  ;;  %v847_v46 = vadd.f32 1.0, %v1178_v44 }
0x11db   :  { %v848_v47 = vadd.f32 1.0, %v1180_v45 }
0x11dc   :  { %1181 = vrcp.f32 %v847_v46 }
0x11dd   :  { %1183 = vrcp.f32 %v848_v47 }
0x11e2   :  { %v1182_v48 = vpop.eup %1181 }
0x11e3   :  { %v1184_v49 = vpop.eup %1183  ;;  %v851_v6 = vmul.f32 2.0, %v1182_v48  ;;  %v863_v52 = vrot.slane %v1182_v48, 7 }
0x11e4   :  { %v852_v50 = vmul.f32 2.0, %v1184_v49  ;;  %v864_v53 = vrot.slane %v1184_v49, 6 }
0x11e5   :  { %v1050_v13 = vadd.f32 -1.0, %v851_v6 }
0x11e6   :  { %v1051_v51 = vadd.f32 -1.0, %v852_v50  ;;  %v865_v57 = vsel %vm347_vm5, %v864_v53, %v863_v52 }
0x11e7   :  { %v857_v54 = vrot.slane %v1050_v13, 7 }
0x11e8   :  { %v858_v55 = vrot.slane %v1051_v51, 6 }
0x11ea   :  { %v859_v56 = vsel %vm347_vm5, %v858_v55, %v857_v54 }
0x11eb   :  { %v867_v58 = vsel %vm1546_vm6, %v859_v56, %v865_v57 }
0x11ec   :  { %870 = vrot.lane.b32.xlu1 %v867_v58, %s1391_s18  ;;  %v868_v61 = vmul.f32 %v867_v58, %v805_v26 }
0x125e   :  { %v871_v59 = vpop.permute.xlu1 %870 }
0x125f   :  { %v873_v60 = vmul.f32 %v871_v59, %v867_v58 }
0x1261   :  { %875 = vrot.lane.b32.xlu2 %v873_v60, %s1399_s3 }
0x12bb   :  { %v876_v62 = vpop.permute.xlu2 %875 }
0x12bc   :  { %v878_v63 = vadd.f32 %v876_v62, %v868_v61 }
0x12be   :  { %1185 = vtanh.f32 %v878_v63 }
0x12c4   :  { %v1186_v1 = vpop.eup %1185 }
0x12c5   :  { %881 = vrot.lane.b32.xlu0 %v1186_v1, %s1391_s18 }
0x12cd   :  { %892 = vrot.lane.b32.xlu0 %v878_v63, %s1400_s6 }
0x1337   :  { %v882_v2 = vpop.permute.xlu0 %881 }
0x1338   :  { %v884_v3 = vmul.f32 %v882_v2, %v867_v58 }
0x133a   :  { %v899_v4 = vpack.c.bf16 %v884_v3, %v884_v3  ;;  %886 = vrot.lane.b32.xlu2 %v884_v3, %s1399_s3 }
0x133c   :  { %909 = vrot.lane.b32.xlu1 %v899_v4, %s1399_s3 }
0x133f   :  { %v893_v29 = vpop.permute.xlu0 %892 }
0x1340   :  { %895 = vst.msk [vmem:[#allocation3] sm:$0x3] %vm149_vm0, %v893_v29 }
0x1394   :  { %v887_v10 = vpop.permute.xlu2 %886 }
0x1395   :  { %890 = vst.msk [vmem:[#allocation2] sm:$0x3] %vm149_vm0, %v887_v10 }
0x13ae   :  { %v910_v12 = vpop.permute.xlu1 %909 }
0x13af   :  { %1060 = vmatmul.msk.bf16.vlgmr.msra.gmra.mxu1 %vm305_vm1, %v910_v12 }
0x142c   :  { %v935_v16 = vpop.f32.mrf.mxu1 }
0x142d   :  { %v936_v17 = vadd.f32 %v1105_v15, %v935_v16 }
0x142f   :  { %v939_v18 = vmax.f32 %v936_v17, 0.0 }
0x1431   :  { %v940_v19 = vpack.c.bf16 %v939_v18, %v939_v18 }
0x1433   :  { %1077 = vmatmul.msk.bf16.vlgmr.msra.gmra.mxu2 %vm977_vm7, %v940_v19 }
0x1434   :  { %v937_v20 = vpop.f32.mrf.mxu1 }
0x14b6   :  { %v990_v22 = vpop.f32.mrf.mxu2 }
0x14b7   :  { %v991_v23 = vadd.f32 %v1106_v21, %v990_v22 }
0x14b9   :  { %994 = vst [vmem:[#allocation16] sm:$0x3] %v991_v23 }
0x14ba   :  { %1005 = dma.vmem_to_hbm [thread:$0]  %s1001_s17, 32, %s1003_s20, [#allocation6]  }
0x14be   :  { %v992_v24 = vpop.f32.mrf.mxu2 }
0x14bf   :  { %1387 = dma.done.wait [#allocation6], 32  }
0x14c0   :  { %1388 = vsyncadd [#allocation6], 4294967264 }
0x14c1   :  { %1010 = vsyncpa [#allocation5], 1 }
0x14c2   :  { %1011 = vsyncpa [#allocation8], 1 }
0x14c3   :  { %1012 = vsyncpa [#allocation11], 1 }
0x14c4   :  { %1013 = vsyncpa [#allocation14], 1 }
0x14c5   :  { %1014 = vsyncpa [#allocation6], 1 }

</bundles_post_ra>
